<compile_context>
chip_gen: v5e
topology: v5e:2x2
jax: 0.10.0
libtpu: 0.0.40
codegen_flags: <defaults>
</compile_context>

<pallas_src>
import functools
import numpy as np
import jax
import jax.numpy as jnp
from jax import lax
from jax.experimental import pallas as pl
from jax.experimental.pallas import tpu as pltpu

EPS = 1e-5                      # nn.BatchNorm1d default eps
_VMEM_LIMIT_BYTES = 48 * 1024 * 1024


def _round_up(a, b):
    return -(-a // b) * b


# --------------------------------------------------------------------------- kernels


def _make_conv_kernel(branch_specs, apply_bn, use_in_mask, valid_cols,
                      compute_dtype, margin):
    """[optional BN+ReLU(+re-zero) prologue] -> per-branch multi-tap conv matmuls ->
    per-branch masked (sum, sum_sq) BN partials.

    branch_specs: tuple of (taps, stats_kind) with stats_kind in {"in", "out"}.
    valid_cols:   N * Wp -- columns belonging to real (non-padding) samples.
    """
    nb = len(branch_specs)

    def kernel(*refs):
        idx = 0
        if apply_bn:
            scale_ref, shift_ref = refs[0], refs[1]
            idx = 2
        mask_ref = refs[idx]; idx += 1
        x_ref = refs[idx]; idx += 1
        w_refs = refs[idx:idx + nb]; idx += nb
        out_refs = refs[idx:idx + 2 * nb]; idx += 2 * nb
        scr_ref = refs[idx] if margin > 0 else None

        a = x_ref[...].astype(jnp.float32)
        cin, cols = a.shape

        # Batch-padding guard (dummy samples only ever live past column N*Wp):
        # pure iota + compare, no HBM traffic, hides under the matmul.
        gcol = lax.broadcasted_iota(jnp.int32, (1, cols), 1) + pl.program_id(0) * cols
        samp_ok = gcol < valid_cols
        # Per-sample column patterns (identical for every tile, fetched once).
        in_ok = (mask_ref[0:1, :] > 0.5) & samp_ok
        out_ok = (mask_ref[1:2, :] > 0.5) & samp_ok

        if apply_bn:
            # BN folded into a single FMA, then ReLU.
            a = jnp.maximum(a * scale_ref[...] + shift_ref[...], 0.0)
            if use_in_mask:
                # conv2 zero-pads its *input* (= relu(bn1(conv1 x))): re-zero every
                # column that is not a real input position so neighbour taps see zeros.
                a = jnp.where(in_ok, a, 0.0)

        ac = a.astype(compute_dtype)
        if margin > 0:
            # Stage the activation with a right margin so every tap is a static lane
            # offset (no halo, no selector matmul, no concat temp).
            scr_ref[:, :cols] = ac

            @pl.when(pl.program_id(0) == 0)
            def _zero_margin():
                # Written once: the margin only feeds dummy output columns, which are
                # masked out of the stats and discarded by the wrapper, so stale data
                # on another megacore shard is harmless.
                scr_ref[:, cols:] = jnp.zeros((cin, margin), compute_dtype)

        for b, (taps, stats_kind) in enumerate(branch_specs):
            w_ref = w_refs[b]
            # One accumulating MXU matmul per tap (f32 accumulation).
            y = None
            for t, d in enumerate(taps):
                src = ac if d == 0 else scr_ref[:, d:d + cols]
                part = jnp.dot(w_ref[:, t * cin:(t + 1) * cin], src,
                               preferred_element_type=jnp.float32)
                y = part if y is None else y + part
            out_refs[2 * b][...] = y.astype(out_refs[2 * b].dtype)

            # One-pass BN partials over the real columns, taken from the f32
            # accumulator (before any storage downcast).  Single full-block store.
            ok = in_ok if stats_kind == "in" else out_ok
            ym = jnp.where(ok, y, 0.0)
            s0 = jnp.sum(ym, axis=1, keepdims=True)        # (C_out, 1)
            s1 = jnp.sum(ym * ym, axis=1, keepdims=True)   # (C_out, 1)
            out_refs[2 * b + 1][...] = jnp.concatenate([s0, s1], axis=1)[None]

    return kernel


def _make_finalize_kernel(ident_tap, margin):
    """out = relu(bn3(h3) + bn_d(identity)); the identity is optionally read at a
    static lane offset so the stride-1 path never materializes an identity tensor."""

    def kernel(*refs):
        if margin > 0:
            s3_ref, b3_ref, sd_ref, bd_ref, h3_ref, id_ref, out_ref, scr_ref = refs
        else:
            s3_ref, b3_ref, sd_ref, bd_ref, h3_ref, id_ref, out_ref = refs

        main = h3_ref[...].astype(jnp.float32) * s3_ref[...] + b3_ref[...]
        idv = id_ref[...].astype(jnp.float32)
        if margin > 0:
            c, cols = idv.shape
            scr_ref[:, :cols] = idv

            @pl.when(pl.program_id(0) == 0)
            def _zero_margin():
                scr_ref[:, cols:] = jnp.zeros((c, margin), jnp.float32)

            idv = scr_ref[:, ident_tap:ident_tap + cols]
        ident = idv * sd_ref[...] + bd_ref[...]
        out_ref[...] = jnp.maximum(main + ident, 0.0).astype(out_ref.dtype)

    return kernel


# --------------------------------------------------------------------------- pass builders


def _conv_pass(x_cols, masks, branches, *, bn, use_in_mask, valid_cols,
               n_tiles, tile_cols, compute_dtype, act_dtype):
    """One tiled pallas_call running one or more conv branches on the same input tile.

    branches: list of (w_packed (C_out, K*C_in), taps tuple, stats_kind)."""
    c_in, total = x_cols.shape
    branch_specs = tuple((taps, kind) for (_, taps, kind) in branches)
    margin = max(max(taps) for taps, _ in branch_specs)

    kernel = _make_conv_kernel(branch_specs, bn is not None, use_in_mask,
                               valid_cols, compute_dtype, margin)

    tile_in = pl.BlockSpec((c_in, tile_cols), lambda i: (0, i))
    full = lambda arr: pl.BlockSpec(arr.shape, lambda i: (0,) * arr.ndim)

    inputs, in_specs = [], []
    if bn is not None:
        scale, shift = bn
        inputs += [scale, shift]
        in_specs += [full(scale), full(shift)]
    inputs += [masks, x_cols]
    in_specs += [full(masks), tile_in]

    out_specs, out_shapes = [], []
    for w, _, _ in branches:
        inputs.append(w)
        in_specs.append(full(w))
        c_out = w.shape[0]
        out_specs += [pl.BlockSpec((c_out, tile_cols), lambda i: (0, i)),
                      pl.BlockSpec((1, c_out, 2), lambda i: (i, 0, 0))]
        out_shapes += [jax.ShapeDtypeStruct((c_out, total), act_dtype),
                       jax.ShapeDtypeStruct((n_tiles, c_out, 2), jnp.float32)]

    scratch = ([pltpu.VMEM((c_in, tile_cols + margin), compute_dtype)]
               if margin > 0 else [])

    outs = pl.pallas_call(
        kernel,
        grid=(n_tiles,),
        in_specs=in_specs,
        out_specs=tuple(out_specs),
        out_shape=tuple(out_shapes),
        scratch_shapes=scratch,
        compiler_params=pltpu.CompilerParams(
            dimension_semantics=("parallel",),
            vmem_limit_bytes=_VMEM_LIMIT_BYTES),
    )(*inputs)
    return [(outs[2 * b], outs[2 * b + 1]) for b in range(len(branches))]


def _finalize_pass(h3, ident, s3, b3, sd, bd, *, ident_tap, n_tiles, tile_cols):
    c_out, total = h3.shape
    margin = ident_tap
    kernel = _make_finalize_kernel(ident_tap, margin)
    tile = lambda arr: pl.BlockSpec((arr.shape[0], tile_cols), lambda i: (0, i))
    full = lambda arr: pl.BlockSpec(arr.shape, lambda i: (0, 0))
    scratch = ([pltpu.VMEM((ident.shape[0], tile_cols + margin), jnp.float32)]
               if margin > 0 else [])
    return pl.pallas_call(
        kernel,
        grid=(n_tiles,),
        in_specs=[full(s3), full(b3), full(sd), full(bd), tile(h3), tile(ident)],
        out_specs=pl.BlockSpec((c_out, tile_cols), lambda i: (0, i)),
        out_shape=jax.ShapeDtypeStruct((c_out, total), jnp.float32),
        scratch_shapes=scratch,
        compiler_params=pltpu.CompilerParams(
            dimension_semantics=("parallel",),
            vmem_limit_bytes=_VMEM_LIMIT_BYTES),
    )(s3, b3, sd, bd, h3, ident)


def _bn_scale_shift(partial_stats, count, gamma, beta):
    """Finalize per-channel train-mode BN from per-tile (sum, sum_sq) partials."""
    s = jnp.sum(partial_stats, axis=0)                      # (C, 2)
    mean = s[:, 0] / count
    var = jnp.maximum(s[:, 1] / count - mean * mean, 0.0)   # biased variance (train mode)
    scale = gamma.astype(jnp.float32) * lax.rsqrt(var + EPS)
    shift = beta.astype(jnp.float32) - mean * scale
    return scale.reshape(-1, 1), shift.reshape(-1, 1)


# --------------------------------------------------------------------------- forward


@functools.partial(jax.jit,
                   static_argnames=("kernel_size", "stride", "samples_per_tile",
                                    "compute_dtype"))
def bottleneck_forward(x, params, *, kernel_size=3, stride=1,
                       samples_per_tile=None, compute_dtype=jnp.float32):
    """x: (N, Cin, L) float32 (PyTorch NCL).  Returns (N, Cout, Lout).

    compute_dtype=jnp.bfloat16 enables bf16 MXU operands + bf16 intermediates
    (the perf path on v5e/v6e/v7x); f32 default matches PyTorch numerics tightly."""
    N, Cin, L = x.shape
    w1, w2, w3 = params["w1"], params["w2"], params["w3"]
    Cmid, Cout = w1.shape[0], w3.shape[0]
    K, s = kernel_size, stride
    pad = K // 2
    Lout = (L + 2 * pad - K) // s + 1
    Lp = L + 2 * pad
    has_ds = params.get("wd") is not None
    f32 = jnp.float32
    act_dtype = compute_dtype   # intermediate-activation storage dtype (BN stats stay f32)

    # Phase-split padded per-sample layout: column j = r*Mp + m  <->  padded input
    # position p = m*s + r (input position l = p - pad).  "Read input at l_out*s + k"
    # becomes the static lane offset d(k) = (k % s)*Mp + k//s from the output column.
    Mp = max(-(-Lp // s), Lout + (K - 1) // s)
    W = s * Mp
    Wp = _round_up(max(W, Lout), 128)            # lane-dense per-sample width (x128)
    taps = tuple((k % s) * Mp + k // s for k in range(K))
    d_ds = (pad % s) * Mp + pad // s             # strided 1x1 downsample offset
    d_id = pad                                   # stride-1 identity offset

    # Tiling: whole samples per tile -> no halo.  Budget ~6 MiB of activations per
    # stage; keep >= 2 grid tiles when N >= 2 so both v7x TensorCores get work.
    if samples_per_tile is None:
        bytes_per_col = 4 * (3 * max(Cin, Cmid, Cout) + 2 * (Cmid + Cout))
        budget_cols = max(Wp, (6 << 20) // max(bytes_per_col, 1))
        samples_per_tile = max(1, min(N, budget_cols // Wp))
        if N >= 2:
            samples_per_tile = min(samples_per_tile, (N + 1) // 2)
    NT = samples_per_tile
    Np = _round_up(N, NT)
    n_tiles = Np // NT
    tile_cols = NT * Wp
    total = Np * Wp
    valid_cols = N * Wp

    # ---- kernel-layout input (Cin, Np*Wp) ----
    # TODO(synk): this NCL -> (C, columns) layout plumbing (and the inverse at the end)
    # is still done by XLA in the wrapper; it could be folded into the BlockSpecs.
    xt = jnp.transpose(x.astype(f32), (1, 0, 2))                       # (Cin, N, L)
    xt = jnp.pad(xt, ((0, 0), (0, Np - N), (pad, W - L - pad)))        # (Cin, Np, W)
    xk = jnp.transpose(xt.reshape(Cin, Np, Mp, s), (0, 1, 3, 2)).reshape(Cin, Np, W)
    xk = jnp.pad(xk, ((0, 0), (0, 0), (0, Wp - W))).reshape(Cin, total)

    # ---- per-tile column patterns (identical for every tile, DMA'd once per pass) ----
    col = np.arange(Wp)
    r_idx, m_idx = col // Mp, col % Mp
    l_idx = m_idx * s + r_idx - pad
    in_pat = ((col < W) & (l_idx >= 0) & (l_idx < L)).astype(np.float32)
    out_pat = (col < Lout).astype(np.float32)
    masks = jnp.asarray(np.stack([np.tile(in_pat, NT), np.tile(out_pat, NT)]))
    count_in, count_out = float(N * L), float(N * Lout)

    # ---- weights: 1x1 convs flattened, conv2's K taps packed along the contraction
    # axis; cast to the MXU compute dtype once here (never per grid step). ----
    w1p = w1[:, :, 0].astype(compute_dtype)                                  # (Cmid, Cin)
    w2p = jnp.concatenate([w2[:, :, k] for k in range(K)],
                          axis=1).astype(compute_dtype)                      # (Cmid, K*Cmid)
    w3p = w3[:, :, 0].astype(compute_dtype)                                  # (Cout, Cmid)

    common = dict(valid_cols=valid_cols, n_tiles=n_tiles, tile_cols=tile_cols,
                  compute_dtype=compute_dtype, act_dtype=act_dtype)

    # P1 (+ P1d fused): conv1 and the strided 1x1 downsample read the same xk tile.
    branches1 = [(w1p, (0,), "in")]
    if has_ds:
        wdp = params["wd"][:, :, 0].astype(compute_dtype)
        branches1.append((wdp, (d_ds,), "out"))
    res1 = _conv_pass(xk, masks, branches1, bn=None, use_in_mask=False, **common)
    h1, st1 = res1[0]
    sc1, sh1 = _bn_scale_shift(st1, count_in, params["g1"], params["b1"])

    # P2: bn1+relu -> conv2 (K taps, K accumulating matmuls) + BN2 partials
    (h2, st2), = _conv_pass(h1, masks, [(w2p, taps, "out")], bn=(sc1, sh1),
                            use_in_mask=True, **common)
    sc2, sh2 = _bn_scale_shift(st2, count_out, params["g2"], params["b2"])

    # P3: bn2+relu -> conv3 (1x1) + BN3 partials (no input re-zero mask needed: the
    # 1x1 conv is column-isolated and dummy columns are excluded from stats anyway).
    (h3, st3), = _conv_pass(h2, masks, [(w3p, (0,), "out")], bn=(sc2, sh2),
                            use_in_mask=False, **common)
    sc3, sh3 = _bn_scale_shift(st3, count_out, params["g3"], params["b3"])

    # P4: relu(bn3(h3) + bn_d(identity))
    if has_ds:
        hd, std = res1[1]
        scd, shd = _bn_scale_shift(std, count_out, params["gd"], params["bd"])
        ident_src, ident_tap = hd, 0
    else:
        scd = jnp.ones((Cout, 1), f32)
        shd = jnp.zeros((Cout, 1), f32)
        ident_src, ident_tap = xk, d_id     # read x in-kernel at the static offset pad
    outk = _finalize_pass(h3, ident_src, sc3, sh3, scd, shd,
                          ident_tap=ident_tap, n_tiles=n_tiles, tile_cols=tile_cols)

    # kernel layout -> NCL
    out = outk.reshape(Cout, Np, Wp)[:, :N, :Lout]
    return jnp.transpose(out, (1, 0, 2))


# --------------------------------------------------------------------------- reference


def reference_forward(x, params, *, kernel_size=3, stride=1):
    """Pure-JAX reference matching the PyTorch module's forward (train-mode BN)."""
    def conv1d(t, w, stride=1, pad=0):
        return lax.conv_general_dilated(
            t, w, window_strides=(stride,), padding=[(pad, pad)],
            dimension_numbers=("NCH", "OIH", "NCH"))

    def bn_train(t, g, b):
        mean = jnp.mean(t, axis=(0, 2), keepdims=True)
        var = jnp.mean((t - mean) ** 2, axis=(0, 2), keepdims=True)
        return (t - mean) / jnp.sqrt(var + EPS) * g.reshape(1, -1, 1) + b.reshape(1, -1, 1)

    out = conv1d(x, params["w1"])
    out = jax.nn.relu(bn_train(out, params["g1"], params["b1"]))
    out = conv1d(out, params["w2"], stride=stride, pad=kernel_size // 2)
    out = jax.nn.relu(bn_train(out, params["g2"], params["b2"]))
    out = conv1d(out, params["w3"])
    out = bn_train(out, params["g3"], params["b3"])
    if params.get("wd") is not None:
        identity = conv1d(x, params["wd"], stride=stride)
        identity = bn_train(identity, params["gd"], params["bd"])
    else:
        identity = x
    return jax.nn.relu(out + identity)


def _make_params(key, Cin, Cout, K, with_ds):
    Cmid = Cout // 4
    ks = jax.random.split(key, 12)
    p = dict(
        w1=0.2 * jax.random.normal(ks[0], (Cmid, Cin, 1), jnp.float32),
        w2=0.2 * jax.random.normal(ks[1], (Cmid, Cmid, K), jnp.float32),
        w3=0.2 * jax.random.normal(ks[2], (Cout, Cmid, 1), jnp.float32),
        g1=1.0 + 0.1 * jax.random.normal(ks[3], (Cmid,), jnp.float32),
        b1=0.1 * jax.random.normal(ks[4], (Cmid,), jnp.float32),
        g2=1.0 + 0.1 * jax.random.normal(ks[5], (Cmid,), jnp.float32),
        b2=0.1 * jax.random.normal(ks[6], (Cmid,), jnp.float32),
        g3=1.0 + 0.1 * jax.random.normal(ks[7], (Cout,), jnp.float32),
        b3=0.1 * jax.random.normal(ks[8], (Cout,), jnp.float32),
    )
    if with_ds:
        p.update(
            wd=0.2 * jax.random.normal(ks[9], (Cout, Cin, 1), jnp.float32),
            gd=1.0 + 0.1 * jax.random.normal(ks[10], (Cout,), jnp.float32),
            bd=0.1 * jax.random.normal(ks[11], (Cout,), jnp.float32),
        )
    return p


if __name__ == "__main__":
    # TODO(synk): BatchNorm running_mean/running_var momentum updates are stateful
    # training-side bookkeeping with no effect on the forward output; not modeled.
    key = jax.random.PRNGKey(0)
    ok = True
    configs = [
        # (name, N, Cin, Cout, K, stride, L)
        ("downsample", 2, 8, 16, 3, 2, 16),   # BottleneckBlock(8, 16, 3, stride=2)
        ("identity",   2, 16, 16, 3, 1, 16),  # BottleneckBlock(16, 16, 3, stride=1)
    ]
    for name, N, Cin, Cout, K, s, L in configs:
        key, kp, kx = jax.random.split(key, 3)
        with_ds = (s != 1) or (Cin != Cout)
        params = _make_params(kp, Cin, Cout, K, with_ds)
        x = jax.random.normal(kx, (N, Cin, L), jnp.float32)

        out = jax.block_until_ready(
            bottleneck_forward(x, params, kernel_size=K, stride=s))
        ref = jax.block_until_ready(
            reference_forward(x, params, kernel_size=K, stride=s))

        pad = K // 2
        Lout = (L + 2 * pad - K) // s + 1
        assert out.shape == ref.shape == (N, Cout, Lout), (name, out.shape, ref.shape)
        err = float(jnp.max(jnp.abs(out - ref)))
        if err > 2e-3:
            ok = False
            print("%s: mismatch vs reference, max abs err = %e" % (name, err))

    if not ok:
        raise SystemExit(1)
    print("KERNEL_OK")
</pallas_src>

<mosaic_0001>
module attributes {stable_mosaic.version = 11 : i64} {
  func.func @kernel(%arg0: i32, %arg1: memref<2x128xf32, #tpu.memory_space<vmem>>, %arg2: memref<8x128xf32, #tpu.memory_space<vmem>>, %arg3: memref<4x8xf32, #tpu.memory_space<vmem>>, %arg4: memref<16x8xf32, #tpu.memory_space<vmem>>, %arg5: memref<4x128xf32, #tpu.memory_space<vmem>>, %arg6: memref<1x4x2xf32, #tpu.memory_space<vmem>>, %arg7: memref<16x128xf32, #tpu.memory_space<vmem>>, %arg8: memref<1x16x2xf32, #tpu.memory_space<vmem>>, %arg9: memref<8x137xf32, #tpu.memory_space<vmem>>) attributes {dimension_semantics = [#tpu.dimension_semantics<parallel>], iteration_bounds = array<i64: 2>, scalar_prefetch = 0 : i64, scratch_operands = 1 : i64, tpu.core_type = #tpu.core_type<tc>, window_params = [{pipeline_mode = #tpu.pipeline_mode<synchronous>, transform_indices = @transform_0, window_bounds = array<i64: 2, 128>}, {transform_indices = @transform_1, window_bounds = array<i64: 8, 128>}, {pipeline_mode = #tpu.pipeline_mode<synchronous>, transform_indices = @transform_2, window_bounds = array<i64: 4, 8>}, {pipeline_mode = #tpu.pipeline_mode<synchronous>, transform_indices = @transform_3, window_bounds = array<i64: 16, 8>}, {transform_indices = @transform_4, window_bounds = array<i64: 4, 128>}, {transform_indices = @transform_5, window_bounds = array<i64: 1, 4, 2>}, {transform_indices = @transform_6, window_bounds = array<i64: 16, 128>}, {transform_indices = @transform_7, window_bounds = array<i64: 1, 16, 2>}]} {
    %c0 = arith.constant 0 : index
    %c0_0 = arith.constant 0 : index
    %0 = vector.load %arg2[%c0, %c0_0] : memref<8x128xf32, #tpu.memory_space<vmem>>, vector<8x128xf32>
    %1 = tpu.iota {dimensions = array<i32: 1>} : vector<1x128xi32>
    %c128_i32 = arith.constant 128 : i32
    %2 = arith.muli %arg0, %c128_i32 : i32
    %3 = vector.broadcast %2 : i32 to vector<1x128xi32>
    %4 = arith.addi %1, %3 : vector<1x128xi32>
    %c256_i32 = arith.constant 256 : i32
    %5 = vector.broadcast %c256_i32 : i32 to vector<1x128xi32>
    %6 = arith.cmpi slt, %4, %5 : vector<1x128xi32>
    %c0_1 = arith.constant 0 : index
    %c0_2 = arith.constant 0 : index
    %7 = vector.load %arg1[%c0_1, %c0_2] : memref<2x128xf32, #tpu.memory_space<vmem>>, vector<1x128xf32>
    %cst = arith.constant 5.000000e-01 : f32
    %8 = vector.broadcast %cst : f32 to vector<1x128xf32>
    %9 = arith.cmpf ogt, %7, %8 : vector<1x128xf32>
    %10 = arith.andi %9, %6 : vector<1x128xi1>
    %c1 = arith.constant 1 : index
    %c0_3 = arith.constant 0 : index
    %11 = vector.load %arg1[%c1, %c0_3] : memref<2x128xf32, #tpu.memory_space<vmem>>, vector<1x128xf32>
    %cst_4 = arith.constant 5.000000e-01 : f32
    %12 = vector.broadcast %cst_4 : f32 to vector<1x128xf32>
    %13 = arith.cmpf ogt, %11, %12 : vector<1x128xf32>
    %14 = arith.andi %13, %6 : vector<1x128xi1>
    %c0_5 = arith.constant 0 : index
    %c0_6 = arith.constant 0 : index
    %15 = vector.load %arg9[%c0_5, %c0_6] : memref<8x137xf32, #tpu.memory_space<vmem>>, vector<8x128xf32>
    tpu.vector_store %arg9[%c0_5, %c0_6], %0 {strides = array<i32>} : memref<8x137xf32, #tpu.memory_space<vmem>>, vector<8x128xf32>,
    %c0_i32 = arith.constant 0 : i32
    %16 = arith.cmpi eq, %arg0, %c0_i32 : i32
    %17 = arith.extui %16 : i1 to i32
    %c0_i32_7 = arith.constant 0 : i32
    %18 = arith.cmpi ne, %17, %c0_i32_7 : i32
    scf.if %18 {
      %cst_31 = arith.constant 0.000000e+00 : f32
      %50 = vector.broadcast %cst_31 : f32 to vector<8x9xf32>
      %c0_32 = arith.constant 0 : index
      %c128 = arith.constant 128 : index
      %51 = vector.load %arg9[%c0_32, %c128] : memref<8x137xf32, #tpu.memory_space<vmem>>, vector<8x9xf32>
      tpu.vector_store %arg9[%c0_32, %c128], %50 {strides = array<i32>} : memref<8x137xf32, #tpu.memory_space<vmem>>, vector<8x9xf32>,
    } else {
    }
    %c0_8 = arith.constant 0 : index
    %c0_9 = arith.constant 0 : index
    %19 = vector.load %arg3[%c0_8, %c0_9] : memref<4x8xf32, #tpu.memory_space<vmem>>, vector<4x8xf32>
    %cst_10 = arith.constant dense<0.000000e+00> : vector<4x128xf32>
    %20 = tpu.matmul %19, %0, %cst_10 {dimension_numbers = #tpu.dot_dimension_numbers<[1], [0], [0], [1], [0, 0, 1, 1], [], []>} : vector<4x8xf32>, vector<8x128xf32>, vector<4x128xf32> -> vector<4x128xf32>
    %c0_11 = arith.constant 0 : index
    %c0_12 = arith.constant 0 : index
    %21 = vector.load %arg5[%c0_11, %c0_12] : memref<4x128xf32, #tpu.memory_space<vmem>>, vector<4x128xf32>
    tpu.vector_store %arg5[%c0_11, %c0_12], %20 {strides = array<i32>} : memref<4x128xf32, #tpu.memory_space<vmem>>, vector<4x128xf32>,
    %cst_13 = arith.constant 0.000000e+00 : f32
    %22 = vector.shape_cast %10 : vector<1x128xi1> to vector<1x128xi1>
    %23 = vector.broadcast %22 : vector<1x128xi1> to vector<4x128xi1>
    %24 = vector.broadcast %cst_13 : f32 to vector<4x128xf32>
    %25 = arith.select %23, %20, %24 : vector<4x128xi1>, vector<4x128xf32>
    %cst_14 = arith.constant dense<0.000000e+00> : vector<4xf32>
    %26 = vector.multi_reduction <add>, %25, %cst_14 [1] : vector<4x128xf32> to vector<4xf32>
    %27 = vector.shape_cast %26 : vector<4xf32> to vector<4x1xf32>
    %28 = arith.mulf %25, %25 : vector<4x128xf32>
    %cst_15 = arith.constant dense<0.000000e+00> : vector<4xf32>
    %29 = vector.multi_reduction <add>, %28, %cst_15 [1] : vector<4x128xf32> to vector<4xf32>
    %30 = vector.shape_cast %29 : vector<4xf32> to vector<4x1xf32>
    %31 = tpu.concatenate %27, %30 in 1 : vector<4x1xf32>, vector<4x1xf32> -> vector<4x2xf32>
    %32 = vector.shape_cast %31 : vector<4x2xf32> to vector<1x4x2xf32>
    %c0_16 = arith.constant 0 : index
    %c0_17 = arith.constant 0 : index
    %c0_18 = arith.constant 0 : index
    %33 = vector.load %arg6[%c0_16, %c0_17, %c0_18] : memref<1x4x2xf32, #tpu.memory_space<vmem>>, vector<1x4x2xf32>
    tpu.vector_store %arg6[%c0_16, %c0_17, %c0_18], %32 {strides = array<i32>} : memref<1x4x2xf32, #tpu.memory_space<vmem>>, vector<1x4x2xf32>,
    %c0_19 = arith.constant 0 : index
    %c9 = arith.constant 9 : index
    %34 = vector.load %arg9[%c0_19, %c9] : memref<8x137xf32, #tpu.memory_space<vmem>>, vector<8x128xf32>
    %c0_20 = arith.constant 0 : index
    %c0_21 = arith.constant 0 : index
    %35 = vector.load %arg4[%c0_20, %c0_21] : memref<16x8xf32, #tpu.memory_space<vmem>>, vector<16x8xf32>
    %cst_22 = arith.constant dense<0.000000e+00> : vector<16x128xf32>
    %36 = tpu.matmul %35, %34, %cst_22 {dimension_numbers = #tpu.dot_dimension_numbers<[1], [0], [0], [1], [0, 0, 1, 1], [], []>} : vector<16x8xf32>, vector<8x128xf32>, vector<16x128xf32> -> vector<16x128xf32>
    %c0_23 = arith.constant 0 : index
    %c0_24 = arith.constant 0 : index
    %37 = vector.load %arg7[%c0_23, %c0_24] : memref<16x128xf32, #tpu.memory_space<vmem>>, vector<16x128xf32>
    tpu.vector_store %arg7[%c0_23, %c0_24], %36 {strides = array<i32>} : memref<16x128xf32, #tpu.memory_space<vmem>>, vector<16x128xf32>,
    %cst_25 = arith.constant 0.000000e+00 : f32
    %38 = vector.shape_cast %14 : vector<1x128xi1> to vector<1x128xi1>
    %39 = vector.broadcast %38 : vector<1x128xi1> to vector<16x128xi1>
    %40 = vector.broadcast %cst_25 : f32 to vector<16x128xf32>
    %41 = arith.select %39, %36, %40 : vector<16x128xi1>, vector<16x128xf32>
    %cst_26 = arith.constant dense<0.000000e+00> : vector<16xf32>
    %42 = vector.multi_reduction <add>, %41, %cst_26 [1] : vector<16x128xf32> to vector<16xf32>
    %43 = vector.shape_cast %42 : vector<16xf32> to vector<16x1xf32>
    %44 = arith.mulf %41, %41 : vector<16x128xf32>
    %cst_27 = arith.constant dense<0.000000e+00> : vector<16xf32>
    %45 = vector.multi_reduction <add>, %44, %cst_27 [1] : vector<16x128xf32> to vector<16xf32>
    %46 = vector.shape_cast %45 : vector<16xf32> to vector<16x1xf32>
    %47 = tpu.concatenate %43, %46 in 1 : vector<16x1xf32>, vector<16x1xf32> -> vector<16x2xf32>
    %48 = vector.shape_cast %47 : vector<16x2xf32> to vector<1x16x2xf32>
    %c0_28 = arith.constant 0 : index
    %c0_29 = arith.constant 0 : index
    %c0_30 = arith.constant 0 : index
    %49 = vector.load %arg8[%c0_28, %c0_29, %c0_30] : memref<1x16x2xf32, #tpu.memory_space<vmem>>, vector<1x16x2xf32>
    tpu.vector_store %arg8[%c0_28, %c0_29, %c0_30], %48 {strides = array<i32>} : memref<1x16x2xf32, #tpu.memory_space<vmem>>, vector<1x16x2xf32>,
    return
  }
  func.func @transform_0(%arg0: i32) -> (i32, i32) {
    %c0_i32 = arith.constant 0 : i32
    %c0_i32_0 = arith.constant 0 : i32
    %c0_i32_1 = arith.constant 0 : i32
    return %c0_i32, %c0_i32_0 : i32, i32
  }
  func.func @transform_1(%arg0: i32) -> (i32, i32) {
    %c0_i32 = arith.constant 0 : i32
    %c0_i32_0 = arith.constant 0 : i32
    return %c0_i32, %arg0 : i32, i32
  }
  func.func @transform_2(%arg0: i32) -> (i32, i32) {
    %c0_i32 = arith.constant 0 : i32
    %c0_i32_0 = arith.constant 0 : i32
    %c0_i32_1 = arith.constant 0 : i32
    return %c0_i32, %c0_i32_0 : i32, i32
  }
  func.func @transform_3(%arg0: i32) -> (i32, i32) {
    %c0_i32 = arith.constant 0 : i32
    %c0_i32_0 = arith.constant 0 : i32
    %c0_i32_1 = arith.constant 0 : i32
    return %c0_i32, %c0_i32_0 : i32, i32
  }
  func.func @transform_4(%arg0: i32) -> (i32, i32) {
    %c0_i32 = arith.constant 0 : i32
    %c0_i32_0 = arith.constant 0 : i32
    return %c0_i32, %arg0 : i32, i32
  }
  func.func @transform_5(%arg0: i32) -> (i32, i32, i32) {
    %c0_i32 = arith.constant 0 : i32
    %c0_i32_0 = arith.constant 0 : i32
    %c0_i32_1 = arith.constant 0 : i32
    return %arg0, %c0_i32, %c0_i32_0 : i32, i32, i32
  }
  func.func @transform_6(%arg0: i32) -> (i32, i32) {
    %c0_i32 = arith.constant 0 : i32
    %c0_i32_0 = arith.constant 0 : i32
    return %c0_i32, %arg0 : i32, i32
  }
  func.func @transform_7(%arg0: i32) -> (i32, i32, i32) {
    %c0_i32 = arith.constant 0 : i32
    %c0_i32_0 = arith.constant 0 : i32
    %c0_i32_1 = arith.constant 0 : i32
    return %arg0, %c0_i32, %c0_i32_0 : i32, i32, i32
  }
}

module attributes {stable_mosaic.version = 11 : i64} {
  func.func @kernel(%arg0: i32, %arg1: memref<4x1xf32, #tpu.memory_space<vmem>>, %arg2: memref<4x1xf32, #tpu.memory_space<vmem>>, %arg3: memref<2x128xf32, #tpu.memory_space<vmem>>, %arg4: memref<4x128xf32, #tpu.memory_space<vmem>>, %arg5: memref<4x12xf32, #tpu.memory_space<vmem>>, %arg6: memref<4x128xf32, #tpu.memory_space<vmem>>, %arg7: memref<1x4x2xf32, #tpu.memory_space<vmem>>, %arg8: memref<4x137xf32, #tpu.memory_space<vmem>>) attributes {dimension_semantics = [#tpu.dimension_semantics<parallel>], iteration_bounds = array<i64: 2>, scalar_prefetch = 0 : i64, scratch_operands = 1 : i64, tpu.core_type = #tpu.core_type<tc>, window_params = [{pipeline_mode = #tpu.pipeline_mode<synchronous>, transform_indices = @transform_0, window_bounds = array<i64: 4, 1>}, {pipeline_mode = #tpu.pipeline_mode<synchronous>, transform_indices = @transform_1, window_bounds = array<i64: 4, 1>}, {pipeline_mode = #tpu.pipeline_mode<synchronous>, transform_indices = @transform_2, window_bounds = array<i64: 2, 128>}, {transform_indices = @transform_3, window_bounds = array<i64: 4, 128>}, {pipeline_mode = #tpu.pipeline_mode<synchronous>, transform_indices = @transform_4, window_bounds = array<i64: 4, 12>}, {transform_indices = @transform_5, window_bounds = array<i64: 4, 128>}, {transform_indices = @transform_6, window_bounds = array<i64: 1, 4, 2>}]} {
    %c0 = arith.constant 0 : index
    %c0_0 = arith.constant 0 : index
    %0 = vector.load %arg4[%c0, %c0_0] : memref<4x128xf32, #tpu.memory_space<vmem>>, vector<4x128xf32>
    %1 = tpu.iota {dimensions = array<i32: 1>} : vector<1x128xi32>
    %c128_i32 = arith.constant 128 : i32
    %2 = arith.muli %arg0, %c128_i32 : i32
    %3 = vector.broadcast %2 : i32 to vector<1x128xi32>
    %4 = arith.addi %1, %3 : vector<1x128xi32>
    %c256_i32 = arith.constant 256 : i32
    %5 = vector.broadcast %c256_i32 : i32 to vector<1x128xi32>
    %6 = arith.cmpi slt, %4, %5 : vector<1x128xi32>
    %c0_1 = arith.constant 0 : index
    %c0_2 = arith.constant 0 : index
    %7 = vector.load %arg3[%c0_1, %c0_2] : memref<2x128xf32, #tpu.memory_space<vmem>>, vector<1x128xf32>
    %cst = arith.constant 5.000000e-01 : f32
    %8 = vector.broadcast %cst : f32 to vector<1x128xf32>
    %9 = arith.cmpf ogt, %7, %8 : vector<1x128xf32>
    %10 = arith.andi %9, %6 : vector<1x128xi1>
    %c1 = arith.constant 1 : index
    %c0_3 = arith.constant 0 : index
    %11 = vector.load %arg3[%c1, %c0_3] : memref<2x128xf32, #tpu.memory_space<vmem>>, vector<1x128xf32>
    %cst_4 = arith.constant 5.000000e-01 : f32
    %12 = vector.broadcast %cst_4 : f32 to vector<1x128xf32>
    %13 = arith.cmpf ogt, %11, %12 : vector<1x128xf32>
    %14 = arith.andi %13, %6 : vector<1x128xi1>
    %c0_5 = arith.constant 0 : index
    %c0_6 = arith.constant 0 : index
    %15 = vector.load %arg1[%c0_5, %c0_6] : memref<4x1xf32, #tpu.memory_space<vmem>>, vector<4x1xf32>
    %16 = vector.broadcast %15 : vector<4x1xf32> to vector<4x128xf32>
    %17 = arith.mulf %0, %16 : vector<4x128xf32>
    %c0_7 = arith.constant 0 : index
    %c0_8 = arith.constant 0 : index
    %18 = vector.load %arg2[%c0_7, %c0_8] : memref<4x1xf32, #tpu.memory_space<vmem>>, vector<4x1xf32>
    %19 = vector.broadcast %18 : vector<4x1xf32> to vector<4x128xf32>
    %20 = arith.addf %17, %19 : vector<4x128xf32>
    %cst_9 = arith.constant 0.000000e+00 : f32
    %21 = vector.broadcast %cst_9 : f32 to vector<4x128xf32>
    %22 = arith.maximumf %20, %21 : vector<4x128xf32>
    %cst_10 = arith.constant 0.000000e+00 : f32
    %23 = vector.shape_cast %10 : vector<1x128xi1> to vector<1x128xi1>
    %24 = vector.broadcast %23 : vector<1x128xi1> to vector<4x128xi1>
    %25 = vector.broadcast %cst_10 : f32 to vector<4x128xf32>
    %26 = arith.select %24, %22, %25 : vector<4x128xi1>, vector<4x128xf32>
    %c0_11 = arith.constant 0 : index
    %c0_12 = arith.constant 0 : index
    %27 = vector.load %arg8[%c0_11, %c0_12] : memref<4x137xf32, #tpu.memory_space<vmem>>, vector<4x128xf32>
    tpu.vector_store %arg8[%c0_11, %c0_12], %26 {strides = array<i32>} : memref<4x137xf32, #tpu.memory_space<vmem>>, vector<4x128xf32>,
    %c0_i32 = arith.constant 0 : i32
    %28 = arith.cmpi eq, %arg0, %c0_i32 : i32
    %29 = arith.extui %28 : i1 to i32
    %c0_i32_13 = arith.constant 0 : i32
    %30 = arith.cmpi ne, %29, %c0_i32_13 : i32
    scf.if %30 {
      %cst_32 = arith.constant 0.000000e+00 : f32
      %54 = vector.broadcast %cst_32 : f32 to vector<4x9xf32>
      %c0_33 = arith.constant 0 : index
      %c128 = arith.constant 128 : index
      %55 = vector.load %arg8[%c0_33, %c128] : memref<4x137xf32, #tpu.memory_space<vmem>>, vector<4x9xf32>
      tpu.vector_store %arg8[%c0_33, %c128], %54 {strides = array<i32>} : memref<4x137xf32, #tpu.memory_space<vmem>>, vector<4x9xf32>,
    } else {
    }
    %c0_14 = arith.constant 0 : index
    %c0_15 = arith.constant 0 : index
    %31 = vector.load %arg5[%c0_14, %c0_15] : memref<4x12xf32, #tpu.memory_space<vmem>>, vector<4x4xf32>
    %cst_16 = arith.constant dense<0.000000e+00> : vector<4x128xf32>
    %32 = tpu.matmul %31, %26, %cst_16 {dimension_numbers = #tpu.dot_dimension_numbers<[1], [0], [0], [1], [0, 0, 1, 1], [], []>} : vector<4x4xf32>, vector<4x128xf32>, vector<4x128xf32> -> vector<4x128xf32>
    %c0_17 = arith.constant 0 : index
    %c9 = arith.constant 9 : index
    %33 = vector.load %arg8[%c0_17, %c9] : memref<4x137xf32, #tpu.memory_space<vmem>>, vector<4x128xf32>
    %c0_18 = arith.constant 0 : index
    %c4 = arith.constant 4 : index
    %34 = vector.load %arg5[%c0_18, %c4] : memref<4x12xf32, #tpu.memory_space<vmem>>, vector<4x4xf32>
    %cst_19 = arith.constant dense<0.000000e+00> : vector<4x128xf32>
    %35 = tpu.matmul %34, %33, %cst_19 {dimension_numbers = #tpu.dot_dimension_numbers<[1], [0], [0], [1], [0, 0, 1, 1], [], []>} : vector<4x4xf32>, vector<4x128xf32>, vector<4x128xf32> -> vector<4x128xf32>
    %36 = arith.addf %32, %35 : vector<4x128xf32>
    %c0_20 = arith.constant 0 : index
    %c1_21 = arith.constant 1 : index
    %37 = vector.load %arg8[%c0_20, %c1_21] : memref<4x137xf32, #tpu.memory_space<vmem>>, vector<4x128xf32>
    %c0_22 = arith.constant 0 : index
    %c8 = arith.constant 8 : index
    %38 = vector.load %arg5[%c0_22, %c8] : memref<4x12xf32, #tpu.memory_space<vmem>>, vector<4x4xf32>
    %cst_23 = arith.constant dense<0.000000e+00> : vector<4x128xf32>
    %39 = tpu.matmul %38, %37, %cst_23 {dimension_numbers = #tpu.dot_dimension_numbers<[1], [0], [0], [1], [0, 0, 1, 1], [], []>} : vector<4x4xf32>, vector<4x128xf32>, vector<4x128xf32> -> vector<4x128xf32>
    %40 = arith.addf %36, %39 : vector<4x128xf32>
    %c0_24 = arith.constant 0 : index
    %c0_25 = arith.constant 0 : index
    %41 = vector.load %arg6[%c0_24, %c0_25] : memref<4x128xf32, #tpu.memory_space<vmem>>, vector<4x128xf32>
    tpu.vector_store %arg6[%c0_24, %c0_25], %40 {strides = array<i32>} : memref<4x128xf32, #tpu.memory_space<vmem>>, vector<4x128xf32>,
    %cst_26 = arith.constant 0.000000e+00 : f32
    %42 = vector.shape_cast %14 : vector<1x128xi1> to vector<1x128xi1>
    %43 = vector.broadcast %42 : vector<1x128xi1> to vector<4x128xi1>
    %44 = vector.broadcast %cst_26 : f32 to vector<4x128xf32>
    %45 = arith.select %43, %40, %44 : vector<4x128xi1>, vector<4x128xf32>
    %cst_27 = arith.constant dense<0.000000e+00> : vector<4xf32>
    %46 = vector.multi_reduction <add>, %45, %cst_27 [1] : vector<4x128xf32> to vector<4xf32>
    %47 = vector.shape_cast %46 : vector<4xf32> to vector<4x1xf32>
    %48 = arith.mulf %45, %45 : vector<4x128xf32>
    %cst_28 = arith.constant dense<0.000000e+00> : vector<4xf32>
    %49 = vector.multi_reduction <add>, %48, %cst_28 [1] : vector<4x128xf32> to vector<4xf32>
    %50 = vector.shape_cast %49 : vector<4xf32> to vector<4x1xf32>
    %51 = tpu.concatenate %47, %50 in 1 : vector<4x1xf32>, vector<4x1xf32> -> vector<4x2xf32>
    %52 = vector.shape_cast %51 : vector<4x2xf32> to vector<1x4x2xf32>
    %c0_29 = arith.constant 0 : index
    %c0_30 = arith.constant 0 : index
    %c0_31 = arith.constant 0 : index
    %53 = vector.load %arg7[%c0_29, %c0_30, %c0_31] : memref<1x4x2xf32, #tpu.memory_space<vmem>>, vector<1x4x2xf32>
    tpu.vector_store %arg7[%c0_29, %c0_30, %c0_31], %52 {strides = array<i32>} : memref<1x4x2xf32, #tpu.memory_space<vmem>>, vector<1x4x2xf32>,
    return
  }
  func.func @transform_0(%arg0: i32) -> (i32, i32) {
    %c0_i32 = arith.constant 0 : i32
    %c0_i32_0 = arith.constant 0 : i32
    %c0_i32_1 = arith.constant 0 : i32
    return %c0_i32, %c0_i32_0 : i32, i32
  }
  func.func @transform_1(%arg0: i32) -> (i32, i32) {
    %c0_i32 = arith.constant 0 : i32
    %c0_i32_0 = arith.constant 0 : i32
    %c0_i32_1 = arith.constant 0 : i32
    return %c0_i32, %c0_i32_0 : i32, i32
  }
  func.func @transform_2(%arg0: i32) -> (i32, i32) {
    %c0_i32 = arith.constant 0 : i32
    %c0_i32_0 = arith.constant 0 : i32
    %c0_i32_1 = arith.constant 0 : i32
    return %c0_i32, %c0_i32_0 : i32, i32
  }
  func.func @transform_3(%arg0: i32) -> (i32, i32) {
    %c0_i32 = arith.constant 0 : i32
    %c0_i32_0 = arith.constant 0 : i32
    return %c0_i32, %arg0 : i32, i32
  }
  func.func @transform_4(%arg0: i32) -> (i32, i32) {
    %c0_i32 = arith.constant 0 : i32
    %c0_i32_0 = arith.constant 0 : i32
    %c0_i32_1 = arith.constant 0 : i32
    return %c0_i32, %c0_i32_0 : i32, i32
  }
  func.func @transform_5(%arg0: i32) -> (i32, i32) {
    %c0_i32 = arith.constant 0 : i32
    %c0_i32_0 = arith.constant 0 : i32
    return %c0_i32, %arg0 : i32, i32
  }
  func.func @transform_6(%arg0: i32) -> (i32, i32, i32) {
    %c0_i32 = arith.constant 0 : i32
    %c0_i32_0 = arith.constant 0 : i32
    %c0_i32_1 = arith.constant 0 : i32
    return %arg0, %c0_i32, %c0_i32_0 : i32, i32, i32
  }
}

module attributes {stable_mosaic.version = 11 : i64} {
  func.func @kernel(%arg0: i32, %arg1: memref<16x1xf32, #tpu.memory_space<vmem>>, %arg2: memref<16x1xf32, #tpu.memory_space<vmem>>, %arg3: memref<16x1xf32, #tpu.memory_space<vmem>>, %arg4: memref<16x1xf32, #tpu.memory_space<vmem>>, %arg5: memref<16x128xf32, #tpu.memory_space<vmem>>, %arg6: memref<16x128xf32, #tpu.memory_space<vmem>>, %arg7: memref<16x128xf32, #tpu.memory_space<vmem>>) attributes {dimension_semantics = [#tpu.dimension_semantics<parallel>], iteration_bounds = array<i64: 2>, scalar_prefetch = 0 : i64, scratch_operands = 0 : i64, tpu.core_type = #tpu.core_type<tc>, window_params = [{pipeline_mode = #tpu.pipeline_mode<synchronous>, transform_indices = @transform_0, window_bounds = array<i64: 16, 1>}, {pipeline_mode = #tpu.pipeline_mode<synchronous>, transform_indices = @transform_1, window_bounds = array<i64: 16, 1>}, {pipeline_mode = #tpu.pipeline_mode<synchronous>, transform_indices = @transform_2, window_bounds = array<i64: 16, 1>}, {pipeline_mode = #tpu.pipeline_mode<synchronous>, transform_indices = @transform_3, window_bounds = array<i64: 16, 1>}, {transform_indices = @transform_4, window_bounds = array<i64: 16, 128>}, {transform_indices = @transform_5, window_bounds = array<i64: 16, 128>}, {transform_indices = @transform_6, window_bounds = array<i64: 16, 128>}]} {
    %c0 = arith.constant 0 : index
    %c0_0 = arith.constant 0 : index
    %0 = vector.load %arg5[%c0, %c0_0] : memref<16x128xf32, #tpu.memory_space<vmem>>, vector<16x128xf32>
    %c0_1 = arith.constant 0 : index
    %c0_2 = arith.constant 0 : index
    %1 = vector.load %arg1[%c0_1, %c0_2] : memref<16x1xf32, #tpu.memory_space<vmem>>, vector<16x1xf32>
    %2 = vector.broadcast %1 : vector<16x1xf32> to vector<16x128xf32>
    %3 = arith.mulf %0, %2 : vector<16x128xf32>
    %c0_3 = arith.constant 0 : index
    %c0_4 = arith.constant 0 : index
    %4 = vector.load %arg2[%c0_3, %c0_4] : memref<16x1xf32, #tpu.memory_space<vmem>>, vector<16x1xf32>
    %5 = vector.broadcast %4 : vector<16x1xf32> to vector<16x128xf32>
    %6 = arith.addf %3, %5 : vector<16x128xf32>
    %c0_5 = arith.constant 0 : index
    %c0_6 = arith.constant 0 : index
    %7 = vector.load %arg6[%c0_5, %c0_6] : memref<16x128xf32, #tpu.memory_space<vmem>>, vector<16x128xf32>
    %c0_7 = arith.constant 0 : index
    %c0_8 = arith.constant 0 : index
    %8 = vector.load %arg3[%c0_7, %c0_8] : memref<16x1xf32, #tpu.memory_space<vmem>>, vector<16x1xf32>
    %9 = vector.broadcast %8 : vector<16x1xf32> to vector<16x128xf32>
    %10 = arith.mulf %7, %9 : vector<16x128xf32>
    %c0_9 = arith.constant 0 : index
    %c0_10 = arith.constant 0 : index
    %11 = vector.load %arg4[%c0_9, %c0_10] : memref<16x1xf32, #tpu.memory_space<vmem>>, vector<16x1xf32>
    %12 = vector.broadcast %11 : vector<16x1xf32> to vector<16x128xf32>
    %13 = arith.addf %10, %12 : vector<16x128xf32>
    %14 = arith.addf %6, %13 : vector<16x128xf32>
    %cst = arith.constant 0.000000e+00 : f32
    %15 = vector.broadcast %cst : f32 to vector<16x128xf32>
    %16 = arith.maximumf %14, %15 : vector<16x128xf32>
    %c0_11 = arith.constant 0 : index
    %c0_12 = arith.constant 0 : index
    %17 = vector.load %arg7[%c0_11, %c0_12] : memref<16x128xf32, #tpu.memory_space<vmem>>, vector<16x128xf32>
    tpu.vector_store %arg7[%c0_11, %c0_12], %16 {strides = array<i32>} : memref<16x128xf32, #tpu.memory_space<vmem>>, vector<16x128xf32>,
    return
  }
  func.func @transform_0(%arg0: i32) -> (i32, i32) {
    %c0_i32 = arith.constant 0 : i32
    %c0_i32_0 = arith.constant 0 : i32
    %c0_i32_1 = arith.constant 0 : i32
    return %c0_i32, %c0_i32_0 : i32, i32
  }
  func.func @transform_1(%arg0: i32) -> (i32, i32) {
    %c0_i32 = arith.constant 0 : i32
    %c0_i32_0 = arith.constant 0 : i32
    %c0_i32_1 = arith.constant 0 : i32
    return %c0_i32, %c0_i32_0 : i32, i32
  }
  func.func @transform_2(%arg0: i32) -> (i32, i32) {
    %c0_i32 = arith.constant 0 : i32
    %c0_i32_0 = arith.constant 0 : i32
    %c0_i32_1 = arith.constant 0 : i32
    return %c0_i32, %c0_i32_0 : i32, i32
  }
  func.func @transform_3(%arg0: i32) -> (i32, i32) {
    %c0_i32 = arith.constant 0 : i32
    %c0_i32_0 = arith.constant 0 : i32
    %c0_i32_1 = arith.constant 0 : i32
    return %c0_i32, %c0_i32_0 : i32, i32
  }
  func.func @transform_4(%arg0: i32) -> (i32, i32) {
    %c0_i32 = arith.constant 0 : i32
    %c0_i32_0 = arith.constant 0 : i32
    return %c0_i32, %arg0 : i32, i32
  }
  func.func @transform_5(%arg0: i32) -> (i32, i32) {
    %c0_i32 = arith.constant 0 : i32
    %c0_i32_0 = arith.constant 0 : i32
    return %c0_i32, %arg0 : i32, i32
  }
  func.func @transform_6(%arg0: i32) -> (i32, i32) {
    %c0_i32 = arith.constant 0 : i32
    %c0_i32_0 = arith.constant 0 : i32
    return %c0_i32, %arg0 : i32, i32
  }
}

module attributes {stable_mosaic.version = 11 : i64} {
  func.func @kernel(%arg0: i32, %arg1: memref<4x1xf32, #tpu.memory_space<vmem>>, %arg2: memref<4x1xf32, #tpu.memory_space<vmem>>, %arg3: memref<2x128xf32, #tpu.memory_space<vmem>>, %arg4: memref<4x128xf32, #tpu.memory_space<vmem>>, %arg5: memref<16x4xf32, #tpu.memory_space<vmem>>, %arg6: memref<16x128xf32, #tpu.memory_space<vmem>>, %arg7: memref<1x16x2xf32, #tpu.memory_space<vmem>>) attributes {dimension_semantics = [#tpu.dimension_semantics<parallel>], iteration_bounds = array<i64: 2>, scalar_prefetch = 0 : i64, scratch_operands = 0 : i64, tpu.core_type = #tpu.core_type<tc>, window_params = [{pipeline_mode = #tpu.pipeline_mode<synchronous>, transform_indices = @transform_0, window_bounds = array<i64: 4, 1>}, {pipeline_mode = #tpu.pipeline_mode<synchronous>, transform_indices = @transform_1, window_bounds = array<i64: 4, 1>}, {pipeline_mode = #tpu.pipeline_mode<synchronous>, transform_indices = @transform_2, window_bounds = array<i64: 2, 128>}, {transform_indices = @transform_3, window_bounds = array<i64: 4, 128>}, {pipeline_mode = #tpu.pipeline_mode<synchronous>, transform_indices = @transform_4, window_bounds = array<i64: 16, 4>}, {transform_indices = @transform_5, window_bounds = array<i64: 16, 128>}, {transform_indices = @transform_6, window_bounds = array<i64: 1, 16, 2>}]} {
    %c0 = arith.constant 0 : index
    %c0_0 = arith.constant 0 : index
    %0 = vector.load %arg4[%c0, %c0_0] : memref<4x128xf32, #tpu.memory_space<vmem>>, vector<4x128xf32>
    %1 = tpu.iota {dimensions = array<i32: 1>} : vector<1x128xi32>
    %c128_i32 = arith.constant 128 : i32
    %2 = arith.muli %arg0, %c128_i32 : i32
    %3 = vector.broadcast %2 : i32 to vector<1x128xi32>
    %4 = arith.addi %1, %3 : vector<1x128xi32>
    %c256_i32 = arith.constant 256 : i32
    %5 = vector.broadcast %c256_i32 : i32 to vector<1x128xi32>
    %6 = arith.cmpi slt, %4, %5 : vector<1x128xi32>
    %c1 = arith.constant 1 : index
    %c0_1 = arith.constant 0 : index
    %7 = vector.load %arg3[%c1, %c0_1] : memref<2x128xf32, #tpu.memory_space<vmem>>, vector<1x128xf32>
    %cst = arith.constant 5.000000e-01 : f32
    %8 = vector.broadcast %cst : f32 to vector<1x128xf32>
    %9 = arith.cmpf ogt, %7, %8 : vector<1x128xf32>
    %10 = arith.andi %9, %6 : vector<1x128xi1>
    %c0_2 = arith.constant 0 : index
    %c0_3 = arith.constant 0 : index
    %11 = vector.load %arg1[%c0_2, %c0_3] : memref<4x1xf32, #tpu.memory_space<vmem>>, vector<4x1xf32>
    %12 = vector.broadcast %11 : vector<4x1xf32> to vector<4x128xf32>
    %13 = arith.mulf %0, %12 : vector<4x128xf32>
    %c0_4 = arith.constant 0 : index
    %c0_5 = arith.constant 0 : index
    %14 = vector.load %arg2[%c0_4, %c0_5] : memref<4x1xf32, #tpu.memory_space<vmem>>, vector<4x1xf32>
    %15 = vector.broadcast %14 : vector<4x1xf32> to vector<4x128xf32>
    %16 = arith.addf %13, %15 : vector<4x128xf32>
    %cst_6 = arith.constant 0.000000e+00 : f32
    %17 = vector.broadcast %cst_6 : f32 to vector<4x128xf32>
    %18 = arith.maximumf %16, %17 : vector<4x128xf32>
    %c0_7 = arith.constant 0 : index
    %c0_8 = arith.constant 0 : index
    %19 = vector.load %arg5[%c0_7, %c0_8] : memref<16x4xf32, #tpu.memory_space<vmem>>, vector<16x4xf32>
    %cst_9 = arith.constant dense<0.000000e+00> : vector<16x128xf32>
    %20 = tpu.matmul %19, %18, %cst_9 {dimension_numbers = #tpu.dot_dimension_numbers<[1], [0], [0], [1], [0, 0, 1, 1], [], []>} : vector<16x4xf32>, vector<4x128xf32>, vector<16x128xf32> -> vector<16x128xf32>
    %c0_10 = arith.constant 0 : index
    %c0_11 = arith.constant 0 : index
    %21 = vector.load %arg6[%c0_10, %c0_11] : memref<16x128xf32, #tpu.memory_space<vmem>>, vector<16x128xf32>
    tpu.vector_store %arg6[%c0_10, %c0_11], %20 {strides = array<i32>} : memref<16x128xf32, #tpu.memory_space<vmem>>, vector<16x128xf32>,
    %cst_12 = arith.constant 0.000000e+00 : f32
    %22 = vector.shape_cast %10 : vector<1x128xi1> to vector<1x128xi1>
    %23 = vector.broadcast %22 : vector<1x128xi1> to vector<16x128xi1>
    %24 = vector.broadcast %cst_12 : f32 to vector<16x128xf32>
    %25 = arith.select %23, %20, %24 : vector<16x128xi1>, vector<16x128xf32>
    %cst_13 = arith.constant dense<0.000000e+00> : vector<16xf32>
    %26 = vector.multi_reduction <add>, %25, %cst_13 [1] : vector<16x128xf32> to vector<16xf32>
    %27 = vector.shape_cast %26 : vector<16xf32> to vector<16x1xf32>
    %28 = arith.mulf %25, %25 : vector<16x128xf32>
    %cst_14 = arith.constant dense<0.000000e+00> : vector<16xf32>
    %29 = vector.multi_reduction <add>, %28, %cst_14 [1] : vector<16x128xf32> to vector<16xf32>
    %30 = vector.shape_cast %29 : vector<16xf32> to vector<16x1xf32>
    %31 = tpu.concatenate %27, %30 in 1 : vector<16x1xf32>, vector<16x1xf32> -> vector<16x2xf32>
    %32 = vector.shape_cast %31 : vector<16x2xf32> to vector<1x16x2xf32>
    %c0_15 = arith.constant 0 : index
    %c0_16 = arith.constant 0 : index
    %c0_17 = arith.constant 0 : index
    %33 = vector.load %arg7[%c0_15, %c0_16, %c0_17] : memref<1x16x2xf32, #tpu.memory_space<vmem>>, vector<1x16x2xf32>
    tpu.vector_store %arg7[%c0_15, %c0_16, %c0_17], %32 {strides = array<i32>} : memref<1x16x2xf32, #tpu.memory_space<vmem>>, vector<1x16x2xf32>,
    return
  }
  func.func @transform_0(%arg0: i32) -> (i32, i32) {
    %c0_i32 = arith.constant 0 : i32
    %c0_i32_0 = arith.constant 0 : i32
    %c0_i32_1 = arith.constant 0 : i32
    return %c0_i32, %c0_i32_0 : i32, i32
  }
  func.func @transform_1(%arg0: i32) -> (i32, i32) {
    %c0_i32 = arith.constant 0 : i32
    %c0_i32_0 = arith.constant 0 : i32
    %c0_i32_1 = arith.constant 0 : i32
    return %c0_i32, %c0_i32_0 : i32, i32
  }
  func.func @transform_2(%arg0: i32) -> (i32, i32) {
    %c0_i32 = arith.constant 0 : i32
    %c0_i32_0 = arith.constant 0 : i32
    %c0_i32_1 = arith.constant 0 : i32
    return %c0_i32, %c0_i32_0 : i32, i32
  }
  func.func @transform_3(%arg0: i32) -> (i32, i32) {
    %c0_i32 = arith.constant 0 : i32
    %c0_i32_0 = arith.constant 0 : i32
    return %c0_i32, %arg0 : i32, i32
  }
  func.func @transform_4(%arg0: i32) -> (i32, i32) {
    %c0_i32 = arith.constant 0 : i32
    %c0_i32_0 = arith.constant 0 : i32
    %c0_i32_1 = arith.constant 0 : i32
    return %c0_i32, %c0_i32_0 : i32, i32
  }
  func.func @transform_5(%arg0: i32) -> (i32, i32) {
    %c0_i32 = arith.constant 0 : i32
    %c0_i32_0 = arith.constant 0 : i32
    return %c0_i32, %arg0 : i32, i32
  }
  func.func @transform_6(%arg0: i32) -> (i32, i32, i32) {
    %c0_i32 = arith.constant 0 : i32
    %c0_i32_0 = arith.constant 0 : i32
    %c0_i32_1 = arith.constant 0 : i32
    return %arg0, %c0_i32, %c0_i32_0 : i32, i32, i32
  }
}

</mosaic_0001>

<bundles_post_ra>
// kernel: bottleneck_forward.5
= control target key start
LH: loop header
LB: loop body
LE: loop exit
PB: predicated region body
PF: predicated region fallthrough
CT: control target
= control target key end

     0   :  { %s585_s21 = smov 0   ;;  %s658_s0 = inlined_call_operand.vmem [shape: f32[4,1], index: 0, kind: input, shape index: {}]   ;;  %s659_s1 = inlined_call_operand.vmem [shape: f32[4,1], index: 1, kind: input, shape index: {}]   ;;  %s660_s2 = inlined_call_operand.vmem [shape: f32[2,128], index: 2, kind: input, shape index: {}]   ;;  %s661_s3 = inlined_call_operand.vmem [shape: f32[4,256], index: 3, kind: input, shape index: {}]   ;;  %s662_s4 = inlined_call_operand.vmem [shape: f32[4,12], index: 4, kind: input, shape index: {}]   ;;  %s663_s5 = inlined_call_operand.vmem [shape: f32[4,256], index: 5, kind: output, shape index: {0}]   ;;  %s664_s6 = inlined_call_operand.vmem [shape: f32[2,4,2], index: 6, kind: output, shape index: {1}]  }
   0x1 LB: > { %s591_s22 = sadd.s32 4294967295, %s542_s21   ;;  %p507_p0 = scmp.ge.s32.totalorder %s542_s21, 1  ;;  %s542_s21 = sphi %s585_s21, %s17_s21  }
   0x2   : > { %p214_p1 = scmp.lt.s32.totalorder %s542_s21, 3 }
   0x4   : > { %p215_p2 = pnand %p507_p0, %p214_p1 }
   0x5   : > { %s511_s23 = sshll.u32 (!%p215_p2), %s591_s22, 7  ;;  %p246_p3 = scmp.lt.s32.totalorder (!%p215_p2), %s591_s22, 1 }
   0x6   : > { %218 = sbr.rel (%p215_p2) target bundleno = 548 (0x224), region = 40  ;;  %p512_p4 = scmp.ne.s32.totalorder (!%p215_p2), %s591_s22, 0 }
   0xb   : > { %v259_v0 = vlaneseq  ;;  %v544_v1 = vmov 0   ;;  %v262_v2 = vstv %s511_s23  ;;  %v271_v3 = vld [vmem:[%s658_s0] sm:$0xf]  ;;  %s247_s28 = scalar_select %p246_p3, %s591_s22, 1 }
   0xc   : > { %535 = vset.pattern.permute.xlu0 %v544_v1  ;;  %v268_v5 = vld [vmem:[%s660_s2 + $0x1] sm:$0x1]  ;;  %v265_v9 = vld [vmem:[%s660_s2] sm:$0x1] }
   0xd   : > { %v260_v4 = vand.u32 127, %v259_v0  ;;  %274 = vperm.xlu0 %535, %v271_v3   ;;  %vm269_vm0 = vcmp.gt.f32.partialorder %v268_v5, 0.5  ;;  %s605_s29 = sshll.u32 %s247_s28, 2  ;;  %v278_v7 = vld [vmem:[%s659_s1] sm:$0xf]  ;;  %vm266_vm3 = vcmp.gt.f32.partialorder %v265_v9, 0.5 }
   0xe   : > { %s253_s10 = scalar_lea.vmem %s663_s5, %s605_s29  ;;  %s257_s13 = scalar_lea.vmem %s664_s6, %s605_s29 }
   0xf   : > { %v263_v6 = vadd.s32 %v262_v2, %v260_v4  ;;  %s249_s18 = scalar_lea.vmem %s661_s3, %s605_s29 }
  0x10   : > { %v258_v12 = vld [vmem:[%s249_s18] sm:$0xf] }
  0x11   : > { %vm264_vm1 = vcmp.lt.s32.totalorder %v263_v6, 256 }
  0x12   : > { %vm614_vm2 = vmand %vm269_vm0, %vm264_vm1 }
  0x13   : > { %vm267_vm4 = vmand %vm266_vm3, %vm264_vm1 }
  0x14   : > { %v286_v11 = vsel %vm267_vm4, 1, %v544_v1 }
  0x15   : > { %281 = vperm.xlu0 %535, %v278_v7   ;;  %v287_v13 = vperm.slane %v286_v11, 0 }
  0x17   : > { %vm288_vm5 = vcmp.eq.s32.totalorder %v287_v13, 1 }
  0x7f   : > { %v275_v10 = vpop.permute.xlu0 %274 }
  0x80   : > { %v277_v14 = vmul.f32 %v275_v10, %v258_v12 }
  0x87   : > { %v282_v15 = vpop.permute.xlu0 %281 }
  0x88   : > { %v284_v16 = vadd.f32 %v282_v15, %v277_v14 }
  0x89   : > { %294 = sbr.rel (%p512_p4) target bundleno = 144 (0x90), region = 44 }
  0x8a   : > { %v285_v17 = vmax.f32 %v284_v16, 0.0 }
  0x8c   : > { %v289_v18 = vsel %vm288_vm5, %v285_v17, 0.0 }
  0x8d   : > { %290 = vst [vmem:[#allocation2] sm:$0xf] %v289_v18 }
  0x8e   : > { %vm295_vm6 = vcmask 68608   ;;  %v545_v19 = vmov 0.0  }
  0x8f   : > { %296 = vst.msk [vmem:[#allocation2 + $0x4] sm:$0xf] %vm295_vm6, %v545_v19 }
  0x90 PF: > { %v364_v20 = vld [vmem:[%s662_s4] sm:$0xf]  ;;  %s546_s23 = smov 120   ;;  %s547_s24 = smov 119   ;;  %vm315_vm7 = vcmask 1043456   ;;  %vm312_vm8 = vcmask 31744  }
  0x91   : > { %366 = vrot.lane.b32.xlu1 %v364_v20, %s546_s23  ;;  %v297_v24 = vld [vmem:[%s662_s4] sm:$0xf]  ;;  %s548_s26 = smov 127   ;;  %s549_s27 = smov 124   ;;  %515 = vmatpush.msk.msra.mxu1 %vm315_vm7, %v289_v18  ;;  %vm310_vm9 = vcmask 973824   ;;  %vm376_vm10 = vcmask 1039360  }
  0x92   : > { %516 = vmatmul.msk.f32.vlgmr.msra.gmra.mxu1 %vm312_vm8, %v297_v24  ;;  %v404_v35 = vsel %vm614_vm2, 1, %v544_v1  ;;  %vm415_vm12 = vcmask 7168   ;;  %vm417_vm13 = vcmask 11264  }
  0x93   : > { %v405_v38 = vperm.slane %v404_v35, 0 }
  0x95   : > { %vm406_vm11 = vcmp.eq.s32.totalorder %v405_v38, 1 }
  0x96   : > { %v298_v21 = vld [vmem:[#allocation2] sm:$0xff] }
  0x97   : > { %303 = vst [vmem:[#allocation1] ss:$2 sm:$0xff] %v298_v21 }
  0x9e   : > { %v304_v22 = vld.sshfl [vmem:[#allocation1] sm:$0xff pattern:$0x75316420]  ;;  %v305_v23 = vld.sshfl [vmem:[#allocation1 + $0x8] sm:$0xff pattern:$0x75316420] }
  0x9f   : > { %369 = vst [vmem:[#allocation1] ss:$2 sm:$0xff] %v298_v21  ;;  %306 = vrot.lane.b32.xlu1 %v304_v22, %s547_s24  ;;  %308 = vrot.lane.b32.xlu2 %v305_v23, %s547_s24 }
  0xa6   : > { %v370_v25 = vld.sshfl [vmem:[#allocation1] sm:$0xff pattern:$0x75316420]  ;;  %v371_v26 = vld.sshfl [vmem:[#allocation1 + $0x8] sm:$0xff pattern:$0x75316420] }
  0xa7   : > { %372 = vrot.lane.b32.xlu0 %v370_v25, %s548_s26  ;;  %300 = vrot.lane.b32.xlu2 %v297_v24, %s549_s27 }
  0xaf   : > { %374 = vrot.lane.b32.xlu0 %v371_v26, %s548_s26 }
  0xf9   : > { %v309_v27 = vpop.permute.xlu2 %308 }
 0x101   : > { %v301_v30 = vpop.permute.xlu2 %300 }
 0x103   : > { %v367_v28 = vpop.permute.xlu1 %366 }
 0x10f   : > { %v360_v37 = vpop.f32.mrf.mxu1 }
 0x111   : > { %v307_v29 = vpop.permute.xlu1 %306 }
 0x112   : > { %v311_v31 = vsel %vm310_vm9, %v307_v29, %v309_v27 }
 0x113   : > { %513 = vmatpush.msk.msra.mxu0 %vm315_vm7, %v311_v31 }
 0x114   : > { %514 = vmatmul.msk.f32.vlgmr.msra.gmra.mxu0 %vm312_vm8, %v301_v30 }
 0x119   : > { %v373_v32 = vpop.permute.xlu0 %372 }
 0x121   : > { %v375_v33 = vpop.permute.xlu0 %374 }
 0x122   : > { %v377_v34 = vsel %vm376_vm10, %v373_v32, %v375_v33 }
 0x123   : > { %517 = vmatpush.msk.msra.mxu2 %vm315_vm7, %v377_v34 }
 0x124   : > { %518 = vmatmul.msk.f32.vlgmr.msra.gmra.mxu2 %vm312_vm8, %v367_v28 }
 0x191   : > { %v335_v36 = vpop.f32.mrf.mxu0 }
 0x192   : > { %v361_v39 = vadd.f32 %v360_v37, %v335_v36 }
 0x1a7   : > { %v399_v40 = vpop.f32.mrf.mxu2 }
 0x1a8   : > { %v402_v41 = vadd.f32 %v399_v40, %v361_v39 }
 0x1aa   : > { %403 = vst [vmem:[%s253_s10] sm:$0xf] %v402_v41  ;;  %v407_v42 = vsel %vm406_vm11, %v402_v41, 0.0 }
 0x1ab   : > { %v408_v43 = vsel %vm315_vm7, %v407_v42, 0.0  ;;  %v411_v44 = vmul.f32 %v407_v42, %v407_v42 }
 0x1ac   : > { %409 = vadd.xlane.f32.xlu0 %v408_v43 }
 0x1ad   : > { %v412_v45 = vsel %vm315_vm7, %v411_v44, 0.0 }
 0x1ae   : > { %413 = vadd.xlane.f32.xlu1 %v412_v45 }
 0x21f   : > { %v410_v46 = vpop.xlane.xlu0 %409 }
 0x221   : > { %v414_v47 = vpop.xlane.xlu1 %413 }
 0x222   : > { %v416_v48 = vsel %vm415_vm12, %v410_v46, %v414_v47 }
 0x223   : > { %418 = vst.msk [vmem:[%s257_s13] sm:$0xf] %vm417_vm13, %v416_v48 }
 0x224 PF: > { %s17_s21 = sadd.s32 1, %s542_s21  }
 0x225   : > { %p14_p5 = scmp.ge.s32.totalorder %s17_s21, 4  }
 0x227   :  { %16 = sbr.rel (!%p14_p5) target bundleno = 1 (0x1), region = 86 }

// kernel: bottleneck_forward.7
= control target key start
LH: loop header
LB: loop body
LE: loop exit
PB: predicated region body
PF: predicated region fallthrough
CT: control target
= control target key end

     0   :  { %s634_s21 = smov 0   ;;  %s636_s22 = smov 0   ;;  %s731_s0 = inlined_call_operand.vmem [shape: f32[16,1], index: 0, kind: input, shape index: {}]   ;;  %s732_s1 = inlined_call_operand.vmem [shape: f32[16,1], index: 1, kind: input, shape index: {}]   ;;  %s733_s2 = inlined_call_operand.vmem [shape: f32[16,1], index: 2, kind: input, shape index: {}]   ;;  %s734_s3 = inlined_call_operand.vmem [shape: f32[16,1], index: 3, kind: input, shape index: {}]   ;;  %s735_s4 = inlined_call_operand.vmem [shape: f32[16,256], index: 4, kind: input, shape index: {}]   ;;  %s736_s5 = inlined_call_operand.vmem [shape: f32[16,256], index: 5, kind: input, shape index: {}]   ;;  %s737_s6 = inlined_call_operand.vmem [shape: f32[16,256], index: 6, kind: output, shape index: {}]  }
   0x1   :  { %s638_s23 = smov 0  }
   0x2 LB: > { %s530_s24 = sadd.s32 4294967295, %s596_s23   ;;  %s651_s25 = sadd.s32 1, %s596_s23   ;;  %s596_s23 = sphi %s638_s23, %s742_s23   ;;  %s592_s22 = sphi %s636_s22, %s741_s22   ;;  %s588_s21 = sphi %s634_s21, %s740_s21  }
   0x3   : > { %s104_s26 = ssub.s32 %s596_s23, %s651_s25  ;;  %s107_s27 = sadd.s32 1, %s592_s22 }
   0x4   : > { %p105_p0 = scmp.eq.s32.totalorder %s104_s26, 0  ;;  %p114_p1 = scmp.ne.s32.totalorder %s592_s22, %s588_s21 }
   0x5   : > { %p115_p2 = scmp.eq.s32.totalorder %s596_s23, 0  ;;  %p170_p3 = scmp.eq.s32.totalorder %s530_s24, 1 }
   0x6   : > { %s662_s28 = scalar_select %p105_p0, %s592_s22, %s107_s27  }
   0x7   : > { %p664_p4 = por %p115_p2, %p114_p1  ;;  %p668_p5 = por %p170_p3, %p114_p1 }
   0x8   : > { %p533_p6 = scmp.ge.s32.totalorder %s596_s23, 2 }
   0xa   : > { %204 = sbr.rel (%p533_p6) target bundleno = 27 (0x1b), region = 32 }
   0xf   : > { %207 = sbr.rel (!%p664_p4) target bundleno = 21 (0x15), region = 36  ;;  %s209_s7 = sand.u32 (%p664_p4), 1, %s592_s22  }
  0x10   : > { %s535_s8 = sshll.u32 (%p664_p4), %s596_s23, 3  ;;  %s534_s9 = sshll.u32 (%p664_p4), %s209_s7, 4 }
  0x11   : > { %s213_s12 = scalar_lea.vmem (%p664_p4), %s735_s4, %s535_s8  ;;  %s211_s13 = scalar_lea.vmem (%p664_p4), [#allocation2], %s534_s9 }
  0x12   : > { %v244_v0 = vld [vmem:[%s213_s12] sm:$0xff] (%p664_p4)  ;;  %v246_v1 = vld [vmem:[%s213_s12 + $0x10] sm:$0xff] (%p664_p4) }
  0x13   : > { %245 = vst [vmem:[%s211_s13] sm:$0xff] (%p664_p4), %v244_v0 }
  0x14   : > { %247 = vst [vmem:[%s211_s13 + $0x8] sm:$0xff] %v246_v1 }
  0x15 PF: > { %253 = sbr.rel (!%p664_p4) target bundleno = 27 (0x1b), region = 74  ;;  %s255_s14 = sand.u32 (%p664_p4), 1, %s592_s22  }
  0x16   : > { %s537_s15 = sshll.u32 (%p664_p4), %s596_s23, 3  ;;  %s536_s16 = sshll.u32 (%p664_p4), %s255_s14, 4 }
  0x17   : > { %s259_s19 = scalar_lea.vmem (%p664_p4), %s736_s5, %s537_s15  ;;  %s257_s20 = scalar_lea.vmem (%p664_p4), [#allocation3], %s536_s16 }
  0x18   : > { %v290_v2 = vld [vmem:[%s259_s19] sm:$0xff] (%p664_p4)  ;;  %v292_v3 = vld [vmem:[%s259_s19 + $0x10] sm:$0xff] (%p664_p4) }
  0x19   : > { %291 = vst [vmem:[%s257_s20] sm:$0xff] (%p664_p4), %v290_v2 }
  0x1a   : > { %293 = vst [vmem:[%s257_s20 + $0x8] sm:$0xff] %v292_v3 }
  0x1b PF: > { %p538_p7 = scmp.ge.s32.totalorder %s596_s23, 1  ;;  %p298_p8 = scmp.lt.s32.totalorder %s596_s23, 3 }
  0x1d   : > { %p299_p9 = pnand %p538_p7, %p298_p8 }
  0x1e   : > { %s305_s20 = sand.u32 (!%p299_p9), 1, %s588_s21  }
  0x1f   : > { %302 = sbr.rel (%p299_p9) target bundleno = 185 (0xb9), region = 112  ;;  %s539_s26 = sshll.u32 (!%p299_p9), %s305_s20, 4 }
  0x20   : > { %s307_s27 = scalar_lea.vmem (!%p299_p9), [#allocation2], %s539_s26  ;;  %s314_s29 = scalar_lea.vmem (!%p299_p9), [#allocation3], %s539_s26 }
  0x21   : > { %s343_s21 = scalar_lea.vmem (!%p299_p9), [#allocation4], %s539_s26 }
  0x24   : > { %v376_v4 = vld [vmem:[%s733_s2] sm:$0xff]  ;;  %v598_v6 = vmov 0   ;;  %v377_v8 = vld [vmem:[%s733_s2 + $0x8] sm:$0xff]  ;;  %s543_s7 = sshll.u32 (%p668_p5), %s530_s24, 3 }
  0x25   : > { %v346_v5 = vld [vmem:[%s731_s0] sm:$0xff]  ;;  %572 = vset.pattern.permute.xlu1 %v598_v6  ;;  %571 = vset.pattern.permute.xlu0 %v598_v6  ;;  %v347_v9 = vld [vmem:[%s731_s0 + $0x8] sm:$0xff]  ;;  %s418_s10 = scalar_lea.vmem (%p668_p5), %s737_s6, %s543_s7 }
  0x26   : > { %380 = vperm.xlu1 %572, %v376_v4   ;;  %350 = vperm.xlu0 %571, %v346_v5   ;;  %v360_v7 = vld [vmem:[%s732_s1] sm:$0xff]  ;;  %v361_v10 = vld [vmem:[%s732_s1 + $0x8] sm:$0xff] }
  0x27   : > { %573 = vset.pattern.permute.xlu2 %v598_v6  ;;  %v391_v11 = vld [vmem:[%s734_s3 + $0x8] sm:$0xff]  ;;  %v390_v12 = vld [vmem:[%s734_s3] sm:$0xff] }
  0x28   : > { %364 = vperm.xlu2 %573, %v360_v7   ;;  %v344_v18 = vld [vmem:[%s307_s27] sm:$0xff]  ;;  %v345_v19 = vld [vmem:[%s307_s27 + $0x8] sm:$0xff] }
  0x29   : > { %v374_v20 = vld [vmem:[%s314_s29] sm:$0xff]  ;;  %v375_v21 = vld [vmem:[%s314_s29 + $0x8] sm:$0xff] }
  0x2e   : > { %385 = vperm.xlu1 %572, %v377_v8   ;;  %355 = vperm.xlu0 %571, %v347_v9  }
  0x30   : > { %369 = vperm.xlu2 %573, %v361_v10  }
  0x36   : > { %399 = vperm.xlu1 %572, %v391_v11   ;;  %394 = vperm.xlu0 %571, %v390_v12  }
  0x82   : > { %v365_v15 = vpop.permute.xlu2 %364 }
  0x8a   : > { %v370_v25 = vpop.permute.xlu2 %369 }
  0x98   : > { %v381_v13 = vpop.permute.xlu1 %380  ;;  %v351_v14 = vpop.permute.xlu0 %350 }
  0x99   : > { %v358_v22 = vmul.f32 %v351_v14, %v344_v18  ;;  %v388_v24 = vmul.f32 %v381_v13, %v374_v20 }
  0x9b   : > { %v372_v29 = vadd.f32 %v365_v15, %v358_v22 }
  0xa0   : > { %v386_v16 = vpop.permute.xlu1 %385  ;;  %v356_v17 = vpop.permute.xlu0 %355 }
  0xa1   : > { %v359_v23 = vmul.f32 %v356_v17, %v345_v19  ;;  %v389_v26 = vmul.f32 %v386_v16, %v375_v21 }
  0xa3   : > { %v373_v30 = vadd.f32 %v370_v25, %v359_v23 }
  0xa8   : > { %v400_v27 = vpop.permute.xlu1 %399  ;;  %v395_v28 = vpop.permute.xlu0 %394 }
  0xa9   : > { %v403_v31 = vadd.f32 %v400_v27, %v389_v26  ;;  %v402_v32 = vadd.f32 %v395_v28, %v388_v24 }
  0xab   : > { %v405_v33 = vadd.f32 %v403_v31, %v373_v30  ;;  %v404_v34 = vadd.f32 %v402_v32, %v372_v29 }
  0xac   : > { %416 = sbr.rel (!%p668_p5) target bundleno = 185 (0xb9), region = 124 }
  0xad   : > { %v407_v35 = vmax.f32 %v405_v33, 0.0  ;;  %v406_v36 = vmax.f32 %v404_v34, 0.0 }
  0xaf   : > { %409 = vst [vmem:[%s343_s21 + $0x8] sm:$0xff] %v407_v35 }
  0xb0   : > { %408 = vst [vmem:[%s343_s21] sm:$0xff] %v406_v36 }
  0xb6   : > { %v451_v38 = vld [vmem:[%s343_s21 + $0x8] sm:$0xff] }
  0xb7   : > { %v449_v37 = vld [vmem:[%s343_s21] sm:$0xff]  ;;  %452 = vst [vmem:[%s418_s10 + $0x10] sm:$0xff] %v451_v38 }
  0xb8   : > { %450 = vst [vmem:[%s418_s10] sm:$0xff] %v449_v37 }
  0xb9 PF: > { %p13_p10 = scmp.ge.s32.totalorder %s651_s25, 4   ;;  %s740_s21 = smov %s592_s22 }
  0xba   : > { %s741_s22 = smov %s662_s28  ;;  %s742_s23 = smov %s651_s25 }
  0xbb   :  { %15 = sbr.rel (!%p13_p10) target bundleno = 2 (0x2), region = 201 }

// kernel: bottleneck_forward.4
= control target key start
LH: loop header
LB: loop body
LE: loop exit
PB: predicated region body
PF: predicated region fallthrough
CT: control target
= control target key end

     0   :  { %s741_s24 = smov 0   ;;  %s743_s25 = smov 0   ;;  %s848_s0 = inlined_call_operand.vmem [shape: f32[2,128], index: 0, kind: input, shape index: {}]   ;;  %s849_s1 = inlined_call_operand.vmem [shape: f32[8,256], index: 1, kind: input, shape index: {}]   ;;  %s850_s2 = inlined_call_operand.vmem [shape: f32[4,8], index: 2, kind: input, shape index: {}]   ;;  %s851_s3 = inlined_call_operand.vmem [shape: f32[16,8], index: 3, kind: input, shape index: {}]   ;;  %s852_s4 = inlined_call_operand.vmem [shape: f32[4,256], index: 4, kind: output, shape index: {0}]   ;;  %s853_s5 = inlined_call_operand.vmem [shape: f32[2,4,2], index: 5, kind: output, shape index: {1}]   ;;  %s854_s6 = inlined_call_operand.vmem [shape: f32[16,256], index: 6, kind: output, shape index: {2}]   ;;  %s855_s7 = inlined_call_operand.vmem [shape: f32[2,16,2], index: 7, kind: output, shape index: {3}]  }
   0x1   :  { %s745_s26 = smov 0  }
   0x2 LB: > { %s752_s27 = sadd.s32 4294967295, %s696_s26   ;;  %s754_s28 = sadd.s32 1, %s696_s26   ;;  %s696_s26 = sphi %s745_s26, %s863_s26   ;;  %s692_s25 = sphi %s743_s25, %s862_s25   ;;  %s688_s24 = sphi %s741_s24, %s861_s24  }
   0x3   : > { %s163_s29 = ssub.s32 %s696_s26, %s754_s28  ;;  %s166_s30 = sadd.s32 1, %s692_s25 }
   0x4   : > { %p164_p0 = scmp.eq.s32.totalorder %s163_s29, 0  ;;  %p176_p1 = scmp.ne.s32.totalorder %s692_s25, %s688_s24 }
   0x5   : > { %p177_p2 = scmp.eq.s32.totalorder %s752_s27, 1  ;;  %p624_p3 = scmp.ge.s32.totalorder %s696_s26, 1 }
   0x6   : > { %s761_s8 = scalar_select %p164_p0, %s692_s25, %s166_s30  }
   0x7   : > { %p763_p4 = por %p177_p2, %p176_p1  ;;  %p243_p5 = scmp.lt.s32.totalorder %s696_s26, 3 }
   0x9   : > { %p244_p6 = pnand %p624_p3, %p243_p5 }
   0xa   : > { %s276_s10 = sand.u32 (!%p244_p6), 1, %s688_s24   ;;  %p286_p7 = scmp.lt.s32.totalorder (!%p244_p6), %s752_s27, 1 }
   0xb   : > { %247 = sbr.rel (%p244_p6) target bundleno = 415 (0x19f), region = 36  ;;  %s625_s11 = sshll.u32 (!%p244_p6), %s276_s10, 4 }
   0xc   : > { %s631_s12 = sshll.u32 (!%p244_p6), %s752_s27, 7  ;;  %s802_s16 = scalar_lea.vmem (!%p244_p6), [#allocation3], %s625_s11 }
   0xd   : > { %p632_p8 = scmp.ne.s32.totalorder (!%p244_p6), %s752_s27, 0 }
  0x10   : > { %v304_v0 = vlaneseq  ;;  %v310_v1 = vld [vmem:[%s848_s0] sm:$0x1]  ;;  %v307_v3 = vstv %s631_s12  ;;  %v313_v4 = vld [vmem:[%s848_s0 + $0x1] sm:$0x1]  ;;  %s287_s17 = scalar_select %p286_p7, %s752_s27, 1 }
  0x11   : > { %vm311_vm0 = vcmp.gt.f32.partialorder %v310_v1, 0.5  ;;  %vm314_vm1 = vcmp.gt.f32.partialorder %v313_v4, 0.5 }
  0x12   : > { %v305_v2 = vand.u32 127, %v304_v0  ;;  %s626_s18 = sshll.u32 %s287_s17, 3  ;;  %s627_s19 = sshll.u32 %s287_s17, 2 }
  0x13   : > { %s289_s22 = scalar_lea.vmem %s849_s1, %s626_s18  ;;  %s782_s26 = scalar_lea.vmem %s852_s4, %s627_s19 }
  0x14   : > { %v308_v5 = vadd.s32 %v307_v3, %v305_v2  ;;  %s787_s10 = scalar_lea.vmem %s853_s5, %s627_s19  ;;  %s640_s12 = sshll.u32 %s287_s17, 4  ;;  %v303_v6 = vld [vmem:[%s289_s22] sm:$0xff] }
  0x15   : > { %s796_s15 = scalar_lea.vmem %s855_s7, %s640_s12  ;;  %316 = vst [vmem:[#allocation2] sm:$0xff] %v303_v6  ;;  %320 = sbr.rel (%p632_p8) target bundleno = 28 (0x1c), region = 40 }
  0x16   : > { %vm309_vm2 = vcmp.lt.s32.totalorder %v308_v5, 256 }
  0x17   : > { %vm789_vm3 = vmand %vm311_vm0, %vm309_vm2 }
  0x18   : > { %vm798_vm4 = vmand %vm314_vm1, %vm309_vm2 }
  0x1a   : > { %vm321_vm5 = vcmask 72704   ;;  %v698_v9 = vmov 0.0  }
  0x1b   : > { %322 = vst.msk [vmem:[#allocation2 + $0x8] sm:$0xff] %vm321_vm5, %v698_v9 }
  0x1c PF: > { %343 = vmatpush.msra.mxu0 %v303_v6  ;;  %v323_v12 = vld [vmem:[%s850_s2] sm:$0xf]  ;;  %vm324_vm6 = vcmask 64512   ;;  %s699_s11 = smov 119   ;;  %vm375_vm7 = vcmask 973824   ;;  %v700_v15 = vmov 0  }
  0x1d   : > { %633 = vmatmul.msk.f32.vlgmr.msra.gmra.mxu0 %vm324_vm6, %v323_v12  ;;  %v349_v16 = vsel %vm789_vm3, 1, %v700_v15  ;;  %v367_v19 = vld [vmem:[%s851_s3] sm:$0xff]  ;;  %v368_v20 = vld [vmem:[%s851_s3 + $0x8] sm:$0xff]  ;;  %vm353_vm9 = vcmask 1043456   ;;  %v409_v28 = vsel %vm798_vm4, 1, %v700_v15  ;;  %vm361_vm10 = vcmask 7168  }
  0x1e   : > { %v365_v10 = vld [vmem:[#allocation2] sm:$0xff]  ;;  %v350_v22 = vperm.slane %v349_v16, 0  ;;  %v410_v29 = vperm.slane %v409_v28, 0  ;;  %vm363_vm12 = vcmask 11264   ;;  %vm426_vm13 = vcmask 15360   ;;  %s637_s23 = sshll.u32 (%p763_p4), %s752_s27, 3 }
  0x1f   : > { %s456_s29 = scalar_lea.vmem (%p763_p4), %s854_s6, %s637_s23 }
  0x20   : > { %vm351_vm8 = vcmp.eq.s32.totalorder %v350_v22, 1  ;;  %vm411_vm11 = vcmp.eq.s32.totalorder %v410_v29, 1 }
  0x22   : > { %v366_v11 = vld [vmem:[#allocation2 + $0x8] sm:$0xff] }
  0x23   : > { %v669_v13 = vpack.i.bf16 %v366_v11, %v365_v10 }
  0x25   : > { %670 = vrot.lane.b32.xlu0 %v669_v13, %s699_s11 }
  0x97   : > { %v671_v14 = vpop.permute.xlu0 %670 }
  0x98   : > { %v673_v17 = vunpack.i.h.bf16 %v671_v14  ;;  %v672_v18 = vunpack.i.l.bf16 %v671_v14 }
  0x9a   : > { %v376_v21 = vsel %vm375_vm7, %v672_v18, %v673_v17  ;;  %v345_v23 = vpop.f32.mrf.mxu0 }
  0x9b   : > { %399 = vmatpush.msra.mxu1 %v376_v21  ;;  %641 = vmatpush.msra.mxu2 %v376_v21  ;;  %348 = vst [vmem:[%s782_s26] sm:$0xf] %v345_v23  ;;  %v352_v24 = vsel %vm351_vm8, %v345_v23, 0.0 }
  0x9c   : > { %634 = vmatmul.msk.f32.vlgmr.msra.gmra.mxu1 %vm324_vm6, %v367_v19  ;;  %635 = vmatmul.msk.f32.vlgmr.msra.gmra.mxu2 %vm324_vm6, %v368_v20  ;;  %v357_v25 = vmul.f32 %v352_v24, %v352_v24  ;;  %v354_v26 = vsel %vm353_vm9, %v352_v24, 0.0 }
  0x9d   : > { %355 = vadd.xlane.f32.xlu0 %v354_v26 }
  0x9e   : > { %v358_v27 = vsel %vm353_vm9, %v357_v25, 0.0 }
  0x9f   : > { %359 = vadd.xlane.f32.xlu1 %v358_v27 }
 0x110   : > { %v356_v30 = vpop.xlane.xlu0 %355 }
 0x112   : > { %v360_v31 = vpop.xlane.xlu1 %359 }
 0x113   : > { %v362_v33 = vsel %vm361_vm10, %v356_v30, %v360_v31 }
 0x114   : > { %364 = vst.msk [vmem:[%s787_s10] sm:$0xf] %vm363_vm12, %v362_v33 }
 0x119   : > { %v401_v32 = vpop.f32.mrf.mxu1 }
 0x11a   : > { %407 = vst [vmem:[%s802_s16] sm:$0xff] %v401_v32  ;;  %v412_v34 = vsel %vm411_vm11, %v401_v32, 0.0 }
 0x11b   : > { %414 = vadd.xlane.f32.xlu1 %v412_v34  ;;  %v418_v38 = vmul.f32 %v412_v34, %v412_v34 }
 0x11f   : > { %v404_v35 = vpop.f32.mrf.mxu2 }
 0x120   : > { %408 = vst [vmem:[%s802_s16 + $0x8] sm:$0xff] %v404_v35  ;;  %v413_v36 = vsel %vm411_vm11, %v404_v35, 0.0 }
 0x121   : > { %416 = vadd.xlane.f32.xlu2 %v413_v36  ;;  %v419_v37 = vmul.f32 %v413_v36, %v413_v36  ;;  %v487_v45 = vld [vmem:[%s802_s16] sm:$0xff] (%p763_p4) }
 0x122   : > { %488 = vst [vmem:[%s456_s29] sm:$0xff] (%p763_p4), %v487_v45 }
 0x123   : > { %422 = vadd.xlane.f32.xlu1 %v419_v37 }
 0x127   : > { %v489_v46 = vld [vmem:[%s802_s16 + $0x8] sm:$0xff] (%p763_p4) }
 0x128   : > { %490 = vst [vmem:[%s456_s29 + $0x10] sm:$0xff] (%p763_p4), %v489_v46 }
 0x129   : > { %420 = vadd.xlane.f32.xlu2 %v418_v38 }
 0x18e   : > { %v415_v39 = vpop.xlane.xlu1 %414 }
 0x194   : > { %v417_v40 = vpop.xlane.xlu2 %416 }
 0x196   : > { %v423_v41 = vpop.xlane.xlu1 %422 }
 0x197   : > { %v425_v42 = vsel %vm361_vm10, %v417_v40, %v423_v41 }
 0x198   : > { %428 = vst.msk [vmem:[%s796_s15 + $0x8] sm:$0xff] %vm426_vm13, %v425_v42 }
 0x19a   : > { %454 = sbr.rel (!%p763_p4) target bundleno = 415 (0x19f), region = 52 }
 0x19c   : > { %v421_v43 = vpop.xlane.xlu2 %420 }
 0x19d   : > { %v424_v44 = vsel %vm361_vm10, %v415_v39, %v421_v43 }
 0x19e   : > { %427 = vst.msk [vmem:[%s796_s15] sm:$0xff] %vm426_vm13, %v424_v44 }
 0x19f PF: > { %p15_p9 = scmp.ge.s32.totalorder %s754_s28, 4   ;;  %s861_s24 = smov %s692_s25 }
 0x1a0   : > { %s862_s25 = smov %s761_s8  ;;  %s863_s26 = smov %s754_s28 }
 0x1a1   :  { %17 = sbr.rel (!%p15_p9) target bundleno = 2 (0x2), region = 144 }

// kernel: bottleneck_forward.6
= control target key start
LH: loop header
LB: loop body
LE: loop exit
PB: predicated region body
PF: predicated region fallthrough
CT: control target
= control target key end

     0   :  { %s574_s21 = smov 0   ;;  %s576_s22 = smov 0   ;;  %s648_s0 = inlined_call_operand.vmem [shape: f32[4,1], index: 0, kind: input, shape index: {}]   ;;  %s649_s1 = inlined_call_operand.vmem [shape: f32[4,1], index: 1, kind: input, shape index: {}]   ;;  %s650_s2 = inlined_call_operand.vmem [shape: f32[2,128], index: 2, kind: input, shape index: {}]   ;;  %s651_s3 = inlined_call_operand.vmem [shape: f32[4,256], index: 3, kind: input, shape index: {}]   ;;  %s652_s4 = inlined_call_operand.vmem [shape: f32[16,4], index: 4, kind: input, shape index: {}]   ;;  %s653_s5 = inlined_call_operand.vmem [shape: f32[16,256], index: 5, kind: output, shape index: {0}]   ;;  %s654_s6 = inlined_call_operand.vmem [shape: f32[2,16,2], index: 6, kind: output, shape index: {1}]  }
   0x1   :  { %s578_s23 = smov 0  }
   0x2 LB: > { %s587_s24 = sadd.s32 4294967295, %s536_s23   ;;  %s589_s25 = sadd.s32 1, %s536_s23   ;;  %s536_s23 = sphi %s578_s23, %s658_s23   ;;  %s532_s22 = sphi %s576_s22, %s657_s22   ;;  %s528_s21 = sphi %s574_s21, %s656_s21  }
   0x3   : > { %s131_s26 = ssub.s32 %s536_s23, %s589_s25  ;;  %s134_s27 = sadd.s32 1, %s532_s22 }
   0x4   : > { %p132_p0 = scmp.eq.s32.totalorder %s131_s26, 0  ;;  %p144_p1 = scmp.ne.s32.totalorder %s532_s22, %s528_s21 }
   0x5   : > { %p145_p2 = scmp.eq.s32.totalorder %s587_s24, 1  ;;  %p473_p3 = scmp.ge.s32.totalorder %s536_s23, 1 }
   0x6   : > { %s597_s28 = scalar_select %p132_p0, %s532_s22, %s134_s27  }
   0x7   : > { %p599_p4 = por %p145_p2, %p144_p1  ;;  %p214_p5 = scmp.lt.s32.totalorder %s536_s23, 3 }
   0x9   : > { %p215_p6 = pnand %p473_p3, %p214_p5 }
   0xa   : > { %p247_p7 = scmp.lt.s32.totalorder (!%p215_p6), %s587_s24, 1  ;;  %s478_s19 = sshll.u32 (!%p215_p6), %s587_s24, 7 }
   0xb   : > { %218 = sbr.rel (%p215_p6) target bundleno = 401 (0x191), region = 40  ;;  %s237_s26 = sand.u32 (!%p215_p6), 1, %s528_s21  }
   0xc   : > { %s474_s27 = sshll.u32 (!%p215_p6), %s237_s26, 4 }
   0xd   : > { %s239_s30 = scalar_lea.vmem (!%p215_p6), [#allocation2], %s474_s27 }
  0x10   : > { %v266_v0 = vld [vmem:[%s648_s0] sm:$0xf]  ;;  %v538_v1 = vmov 0   ;;  %s611_s10 = scalar_select %p247_p7, %s587_s24, 1  ;;  %vm290_vm0 = vcmask 1043456   ;;  %vm283_vm1 = vcmask 31744   ;;  %v257_v11 = vlaneseq }
  0x11   : > { %513 = vset.pattern.permute.xlu0 %v538_v1  ;;  %v273_v2 = vld [vmem:[%s649_s1] sm:$0xf]  ;;  %v282_v10 = vld [vmem:[%s652_s4 + $0x8] sm:$0xff]  ;;  %v260_v13 = vstv %s478_s19  ;;  %vm334_vm6 = vcmask 7168   ;;  %vm337_vm7 = vcmask 15360  }
  0x12   : > { %269 = vperm.xlu0 %513, %v266_v0   ;;  %s475_s11 = sshll.u32 %s611_s10, 2  ;;  %v281_v9 = vld [vmem:[%s652_s4] sm:$0xff]  ;;  %v258_v12 = vand.u32 127, %v257_v11  ;;  %s486_s7 = sshll.u32 %s611_s10, 4 }
  0x13   : > { %s250_s14 = scalar_lea.vmem %s651_s3, %s475_s11  ;;  %v263_v15 = vld [vmem:[%s650_s2 + $0x1] sm:$0x1]  ;;  %s255_s9 = scalar_lea.vmem %s654_s6, %s486_s7 }
  0x14   : > { %v256_v4 = vld [vmem:[%s250_s14] sm:$0xf]  ;;  %v261_v14 = vadd.s32 %v260_v13, %v258_v12  ;;  %vm264_vm3 = vcmp.gt.f32.partialorder %v263_v15, 0.5  ;;  %s483_s11 = sshll.u32 (%p599_p4), %s587_s24, 3 }
  0x15   : > { %s353_s13 = scalar_lea.vmem (%p599_p4), %s653_s5, %s483_s11 }
  0x16   : > { %vm262_vm2 = vcmp.lt.s32.totalorder %v261_v14, 256 }
  0x17   : > { %vm265_vm4 = vmand %vm264_vm3, %vm262_vm2 }
  0x18   : > { %v319_v16 = vsel %vm265_vm4, 1, %v538_v1 }
  0x19   : > { %v320_v17 = vperm.slane %v319_v16, 0 }
  0x1a   : > { %276 = vperm.xlu0 %513, %v273_v2  }
  0x1b   : > { %vm321_vm5 = vcmp.eq.s32.totalorder %v320_v17, 1 }
  0x84   : > { %v270_v3 = vpop.permute.xlu0 %269 }
  0x85   : > { %v272_v5 = vmul.f32 %v270_v3, %v256_v4 }
  0x8c   : > { %v277_v6 = vpop.permute.xlu0 %276 }
  0x8d   : > { %v279_v7 = vadd.f32 %v277_v6, %v272_v5 }
  0x8f   : > { %v280_v8 = vmax.f32 %v279_v7, 0.0 }
  0x91   : > { %479 = vmatpush.msk.msra.mxu0 %vm290_vm0, %v280_v8  ;;  %487 = vmatpush.msk.msra.mxu1 %vm290_vm0, %v280_v8 }
  0x92   : > { %480 = vmatmul.msk.f32.vlgmr.msra.gmra.mxu0 %vm283_vm1, %v281_v9  ;;  %481 = vmatmul.msk.f32.vlgmr.msra.gmra.mxu1 %vm283_vm1, %v282_v10 }
 0x10f   : > { %v311_v18 = vpop.f32.mrf.mxu0  ;;  %v314_v19 = vpop.f32.mrf.mxu1 }
 0x110   : > { %317 = vst [vmem:[%s239_s30] sm:$0xff] %v311_v18  ;;  %v322_v20 = vsel %vm321_vm5, %v311_v18, 0.0  ;;  %v323_v22 = vsel %vm321_vm5, %v314_v19, 0.0 }
 0x111   : > { %324 = vadd.xlane.f32.xlu1 %v322_v20  ;;  %v328_v21 = vmul.f32 %v322_v20, %v322_v20  ;;  %318 = vst [vmem:[%s239_s30 + $0x8] sm:$0xff] %v314_v19  ;;  %v329_v23 = vmul.f32 %v323_v22, %v323_v22 }
 0x113   : > { %330 = vadd.xlane.f32.xlu2 %v328_v21 }
 0x117   : > { %v384_v30 = vld [vmem:[%s239_s30] sm:$0xff] (%p599_p4) }
 0x118   : > { %v386_v31 = vld [vmem:[%s239_s30 + $0x8] sm:$0xff] (%p599_p4)  ;;  %385 = vst [vmem:[%s353_s13] sm:$0xff] (%p599_p4), %v384_v30 }
 0x119   : > { %326 = vadd.xlane.f32.xlu1 %v323_v22  ;;  %387 = vst [vmem:[%s353_s13 + $0x10] sm:$0xff] (%p599_p4), %v386_v31 }
 0x11b   : > { %332 = vadd.xlane.f32.xlu2 %v329_v23 }
 0x184   : > { %v325_v24 = vpop.xlane.xlu1 %324 }
 0x186   : > { %v331_v25 = vpop.xlane.xlu2 %330 }
 0x187   : > { %v335_v26 = vsel %vm334_vm6, %v325_v24, %v331_v25 }
 0x188   : > { %338 = vst.msk [vmem:[%s255_s9] sm:$0xff] %vm337_vm7, %v335_v26 }
 0x18c   : > { %v327_v27 = vpop.xlane.xlu1 %326  ;;  %351 = sbr.rel (!%p599_p4) target bundleno = 401 (0x191), region = 44 }
 0x18e   : > { %v333_v28 = vpop.xlane.xlu2 %332 }
 0x18f   : > { %v336_v29 = vsel %vm334_vm6, %v327_v27, %v333_v28 }
 0x190   : > { %339 = vst.msk [vmem:[%s255_s9 + $0x8] sm:$0xff] %vm337_vm7, %v336_v29 }
 0x191 PF: > { %p14_p8 = scmp.ge.s32.totalorder %s589_s25, 4   ;;  %s656_s21 = smov %s532_s22 }
 0x192   : > { %s657_s22 = smov %s597_s28  ;;  %s658_s23 = smov %s589_s25 }
 0x193   :  { %16 = sbr.rel (!%p14_p8) target bundleno = 2 (0x2), region = 120 }

</bundles_post_ra>
